<compile_context>
chip_gen: v7x
topology: tpu7x:2x2x1
jax: 0.10.0
libtpu: 0.0.40
codegen_flags: <defaults>
</compile_context>

<pallas_src>
import jax
import jax.numpy as jnp
import numpy as np
from jax import lax
from jax.experimental import pallas as pl
from jax.experimental.pallas import tpu as pltpu

LANES = 128
SUBLANES = 8


def _round_up(x, m):
    return (x + m - 1) // m * m


def _pick_tile_rows(H, W, max_flat_rows):
    """Largest divisor of H whose tile (TH*W flattened rows) fits the budget."""
    th = max(1, min(H, max_flat_rows // max(W, 1)))
    while H % th:
        th -= 1
    return th


# ------------------------------ Pallas kernel ------------------------------

def _make_bottleneck_kernel(W, TILE, OFF):
    def kernel(x_ref, xt_ref, xb_ref,
               w1_ref, b1_ref, w2_ref, b2_ref, w3_ref, b3_ref,
               out_ref, t1_ref, tap_ref):
        Pp = t1_ref.shape[1]
        t = pl.program_id(1)
        nt = pl.num_programs(1)

        x = x_ref[...]                        # (TILE, Cp) bf16
        w1 = w1_ref[...]                      # (Cp, Pp) bf16, BN1 scale folded
        b1 = b1_ref[...]                      # (1, Pp) f32

        # ---- conv1 (1x1) + BN1-bias + ReLU on the tile -> f32 halo scratch ----
        h1 = jnp.dot(x, w1, preferred_element_type=jnp.float32)
        t1_ref[OFF:OFF + TILE, :] = jnp.maximum(h1 + b1, 0.0)

        # Halo recompute: conv1 on the image row above / below the tile.
        # At the image boundary (first/last tile) the halo is zero (pad=1).
        top_valid = (t > 0).astype(jnp.float32)
        bot_valid = (t < nt - 1).astype(jnp.float32)
        ht = jnp.dot(xt_ref[...], w1, preferred_element_type=jnp.float32)
        hb = jnp.dot(xb_ref[...], w1, preferred_element_type=jnp.float32)
        t1_ref[OFF - W:OFF, :] = jnp.maximum(ht + b1, 0.0) * top_valid
        t1_ref[OFF + TILE:OFF + TILE + W, :] = jnp.maximum(hb + b1, 0.0) * bot_valid

        # ---- conv2 (3x3, pad=1) + BN2-bias + ReLU ----
        # 9 statically shifted taps are written into a bf16 VMEM slab and
        # contracted in ONE (TILE, 9*Pp) x (9*Pp, Pp) MXU matmul.  The two
        # corner taps touch one never-written row just outside the halo, but
        # only at column-masked positions, so garbage never reaches the MXU.
        col = lax.broadcasted_iota(jnp.int32, (TILE, 1), 0) % W
        mask_l = col != 0            # tap reads column j-1 -> zero at j == 0
        mask_r = col != (W - 1)      # tap reads column j+1 -> zero at j == W-1
        k = 0
        for dy in range(3):
            for dx in range(3):
                start = OFF + (dy - 1) * W + (dx - 1)        # static offset
                tv = t1_ref[start:start + TILE, :]           # (TILE, Pp) f32
                if dx == 0:
                    tv = jnp.where(mask_l, tv, 0.0)
                elif dx == 2:
                    tv = jnp.where(mask_r, tv, 0.0)
                tap_ref[:, k * Pp:(k + 1) * Pp] = tv.astype(jnp.bfloat16)
                k += 1
        h2 = jnp.dot(tap_ref[...], w2_ref[...],
                     preferred_element_type=jnp.float32)
        y2 = jnp.maximum(h2 + b2_ref[...], 0.0)

        # ---- conv3 (1x1) + BN3-bias + identity residual + ReLU -> bf16 ----
        h3 = jnp.dot(y2.astype(jnp.bfloat16), w3_ref[...],
                     preferred_element_type=jnp.float32)
        y3 = h3 + b3_ref[...] + x.astype(jnp.float32)
        out_ref[...] = jnp.maximum(y3, 0.0).astype(out_ref.dtype)

    return kernel


# ------------------------------ wrapper (glue) ------------------------------

def bottleneck_pallas(x_nhwc, p, *, max_tile_rows=1024):
    N, H, W, Cin = x_nhwc.shape
    planes = p['w1'].shape[0]
    Cout = p['w3'].shape[0]
    assert Cin == Cout, "identity residual requires inplanes == planes*expansion"
    assert W % SUBLANES == 0, "W must be a multiple of 8 (aligned tile layout)"

    HW = H * W
    Cp = _round_up(Cin, LANES)        # input/output channels padded to lanes
    Pp = _round_up(planes, LANES)     # mid channels padded to lanes
    Op = _round_up(Cout, LANES)

    # HW tiling: TH image rows per grid step.  max_tile_rows ~1K flattened rows
    # keeps per-step VMEM at a few MiB (sized for v7x's 64 MiB / 32 MiB scoped).
    TH = _pick_tile_rows(H, W, max_tile_rows)
    NT = H // TH
    TILE = TH * W                               # flattened pixels per tile
    OFF = _round_up(W + 1, SUBLANES)            # top halo offset (>= W+1, aligned)
    S = OFF + TILE + OFF                        # scratch rows incl. both halos

    # --- layout packing, channel padding, BN folding (pure XLA glue) ---
    x_p = jnp.pad(x_nhwc.reshape(N, HW, Cin),
                  ((0, 0), (0, 0), (0, Cp - Cin))).astype(jnp.bfloat16)

    def fold_bn(bn):
        scale = bn['gamma'] / jnp.sqrt(bn['var'] + bn['eps'])
        bias = bn['beta'] - bn['mean'] * scale
        return scale, bias

    s1, c1 = fold_bn(p['bn1'])
    s2, c2 = fold_bn(p['bn2'])
    s3, c3 = fold_bn(p['bn3'])

    # BN scales folded into the weight output channels (before the bf16 cast),
    # so the kernel epilogues are `+ bias` then ReLU only.
    w1f = (p['w1'][:, :, 0, 0] * s1[:, None]).T                 # (Cin, planes)
    w1m = jnp.pad(w1f, ((0, Cp - Cin), (0, Pp - planes))).astype(jnp.bfloat16)

    w2_hwio = jnp.transpose(p['w2'] * s2[:, None, None, None],
                            (2, 3, 1, 0))                       # (3,3,cin,cout)
    w2m = jnp.concatenate(
        [jnp.pad(w2_hwio[dy, dx], ((0, Pp - planes), (0, Pp - planes)))
         for dy in range(3) for dx in range(3)], axis=0).astype(jnp.bfloat16)

    w3f = (p['w3'][:, :, 0, 0] * s3[:, None]).T                 # (planes, Cout)
    w3m = jnp.pad(w3f, ((0, Pp - planes), (0, Op - Cout))).astype(jnp.bfloat16)

    def pad_bias(b, cpad):
        return jnp.pad(b, (0, cpad - b.shape[0])).reshape(1, cpad).astype(jnp.float32)

    b1, b2, b3 = pad_bias(c1, Pp), pad_bias(c2, Pp), pad_bias(c3, Op)

    def full2d(shape):
        return pl.BlockSpec(shape, lambda n, t: (0, 0))

    out = pl.pallas_call(
        _make_bottleneck_kernel(W, TILE, OFF),
        out_shape=jax.ShapeDtypeStruct((N, HW, Op), jnp.bfloat16),
        grid=(N, NT),
        in_specs=[
            # main tile + one image row above / below (halo recompute inputs)
            pl.BlockSpec((None, TILE, Cp), lambda n, t: (n, t, 0)),
            pl.BlockSpec((None, W, Cp),
                         lambda n, t: (n, jnp.maximum(t * TH - 1, 0), 0)),
            pl.BlockSpec((None, W, Cp),
                         lambda n, t: (n, jnp.minimum((t + 1) * TH, H - 1), 0)),
            full2d((Cp, Pp)), full2d((1, Pp)),
            full2d((9 * Pp, Pp)), full2d((1, Pp)),
            full2d((Pp, Op)), full2d((1, Op)),
        ],
        out_specs=pl.BlockSpec((None, TILE, Op), lambda n, t: (n, t, 0)),
        scratch_shapes=[
            pltpu.VMEM((S, Pp), jnp.float32),           # haloed conv1 output
            pltpu.VMEM((TILE, 9 * Pp), jnp.bfloat16),   # conv2 tap slab
        ],
        compiler_params=pltpu.CompilerParams(
            dimension_semantics=("parallel", "parallel")),
    )(x_p, x_p, x_p, w1m, b1, w2m, b2, w3m, b3)

    if Op != Cout:                     # skip the un-pad pass when already lane-dense
        out = out[:, :, :Cout]
    return out.reshape(N, H, W, Cout)


# -------------------- pure-JAX reference (same numerics) --------------------

def bottleneck_reference(x_nhwc, p):
    xb = x_nhwc.astype(jnp.bfloat16)

    def conv(x, w_oihw, pad):
        w = jnp.transpose(w_oihw, (2, 3, 1, 0)).astype(jnp.bfloat16)
        return lax.conv_general_dilated(
            x, w, window_strides=(1, 1), padding=((pad, pad), (pad, pad)),
            dimension_numbers=('NHWC', 'HWIO', 'NHWC'),
            preferred_element_type=jnp.float32)

    def bn(y, bnp):
        scale = bnp['gamma'] / jnp.sqrt(bnp['var'] + bnp['eps'])
        bias = bnp['beta'] - bnp['mean'] * scale
        return y * scale.reshape(1, 1, 1, -1) + bias.reshape(1, 1, 1, -1)

    y = jnp.maximum(bn(conv(xb, p['w1'], 0), p['bn1']), 0.0)
    y = jnp.maximum(bn(conv(y.astype(jnp.bfloat16), p['w2'], 1), p['bn2']), 0.0)
    y = bn(conv(y.astype(jnp.bfloat16), p['w3'], 0), p['bn3']) + xb.astype(jnp.float32)
    return jnp.maximum(y, 0.0)


# -------------------------------- parameters --------------------------------

def make_bottleneck_params(key, inplanes, planes, expansion=4):
    ks = jax.random.split(key, 6)

    def conv_w(k, cout, cin, kh, kw):
        std = (2.0 / (cin * kh * kw)) ** 0.5
        return std * jax.random.normal(k, (cout, cin, kh, kw), jnp.float32)

    def bn_p(k, c):
        k1, k2, k3, k4 = jax.random.split(k, 4)
        return dict(gamma=1.0 + 0.1 * jax.random.normal(k1, (c,), jnp.float32),
                    beta=0.05 * jax.random.normal(k2, (c,), jnp.float32),
                    mean=0.1 * jax.random.normal(k3, (c,), jnp.float32),
                    var=1.0 + 0.1 * jnp.abs(jax.random.normal(k4, (c,), jnp.float32)),
                    eps=1e-5)

    return dict(w1=conv_w(ks[0], planes, inplanes, 1, 1), bn1=bn_p(ks[1], planes),
                w2=conv_w(ks[2], planes, planes, 3, 3), bn2=bn_p(ks[3], planes),
                w3=conv_w(ks[4], planes * expansion, planes, 1, 1),
                bn3=bn_p(ks[5], planes * expansion))


# ----------------------------------- main -----------------------------------

if __name__ == "__main__":
    N, inplanes, planes, H = 2, 16, 4, 16     # expansion=4 -> out channels = 16
    key = jax.random.PRNGKey(0)
    kp, kx = jax.random.split(key)
    params = make_bottleneck_params(kp, inplanes, planes)

    # Input in the PyTorch NCHW convention.
    x_nchw = jax.random.normal(kx, (N, inplanes, H, H), jnp.float32)
    x_nhwc = jnp.transpose(x_nchw, (0, 2, 3, 1))   # NCHW -> NHWC at the boundary

    # max_tile_rows=128 forces 2 H*W tiles at this toy size so the halo /
    # tiling path is exercised (production default is ~1024 flattened rows).
    fwd = jax.jit(lambda x, p: bottleneck_pallas(x, p, max_tile_rows=128))
    out = jax.block_until_ready(fwd(x_nhwc, params))

    ref = bottleneck_reference(x_nhwc, params)
    np.testing.assert_allclose(np.asarray(out.astype(jnp.float32)),
                               np.asarray(ref), atol=3e-2, rtol=3e-2)

    out_nchw = jnp.transpose(out, (0, 3, 1, 2))    # back to PyTorch NCHW
    jax.block_until_ready(out_nchw)
    print("KERNEL_OK")
</pallas_src>

<mosaic_0001>
module attributes {stable_mosaic.version = 11 : i64} {
  func.func @kernel(%arg0: i32, %arg1: i32, %arg2: memref<1x128x128xbf16, #tpu.memory_space<vmem>>, %arg3: memref<1x16x128xbf16, #tpu.memory_space<vmem>>, %arg4: memref<1x16x128xbf16, #tpu.memory_space<vmem>>, %arg5: memref<128x128xbf16, #tpu.memory_space<vmem>>, %arg6: memref<1x128xf32, #tpu.memory_space<vmem>>, %arg7: memref<1152x128xbf16, #tpu.memory_space<vmem>>, %arg8: memref<1x128xf32, #tpu.memory_space<vmem>>, %arg9: memref<128x128xbf16, #tpu.memory_space<vmem>>, %arg10: memref<1x128xf32, #tpu.memory_space<vmem>>, %arg11: memref<1x128x128xbf16, #tpu.memory_space<vmem>>, %arg12: memref<176x128xf32, #tpu.memory_space<vmem>>, %arg13: memref<128x1152xbf16, #tpu.memory_space<vmem>>) attributes {dimension_semantics = [#tpu.dimension_semantics<parallel>, #tpu.dimension_semantics<parallel>], iteration_bounds = array<i64: 2, 2>, scalar_prefetch = 0 : i64, scratch_operands = 2 : i64, tpu.core_type = #tpu.core_type<tc>, window_params = [{transform_indices = @transform_0, window_bounds = array<i64: 1, 128, 128>}, {transform_indices = @transform_1, window_bounds = array<i64: 1, 16, 128>}, {transform_indices = @transform_2, window_bounds = array<i64: 1, 16, 128>}, {pipeline_mode = #tpu.pipeline_mode<synchronous>, transform_indices = @transform_3, window_bounds = array<i64: 128, 128>}, {pipeline_mode = #tpu.pipeline_mode<synchronous>, transform_indices = @transform_4, window_bounds = array<i64: 1, 128>}, {pipeline_mode = #tpu.pipeline_mode<synchronous>, transform_indices = @transform_5, window_bounds = array<i64: 1152, 128>}, {pipeline_mode = #tpu.pipeline_mode<synchronous>, transform_indices = @transform_6, window_bounds = array<i64: 1, 128>}, {pipeline_mode = #tpu.pipeline_mode<synchronous>, transform_indices = @transform_7, window_bounds = array<i64: 128, 128>}, {pipeline_mode = #tpu.pipeline_mode<synchronous>, transform_indices = @transform_8, window_bounds = array<i64: 1, 128>}, {transform_indices = @transform_9, window_bounds = array<i64: 1, 128, 128>}]} {
    %c0 = arith.constant 0 : index
    %c0_0 = arith.constant 0 : index
    %c0_1 = arith.constant 0 : index
    %0 = vector.load %arg2[%c0, %c0_0, %c0_1] : memref<1x128x128xbf16, #tpu.memory_space<vmem>>, vector<1x128x128xbf16>
    %1 = vector.shape_cast %0 : vector<1x128x128xbf16> to vector<128x128xbf16>
    %c0_2 = arith.constant 0 : index
    %c0_3 = arith.constant 0 : index
    %2 = vector.load %arg5[%c0_2, %c0_3] : memref<128x128xbf16, #tpu.memory_space<vmem>>, vector<128x128xbf16>
    %c0_4 = arith.constant 0 : index
    %c0_5 = arith.constant 0 : index
    %3 = vector.load %arg6[%c0_4, %c0_5] : memref<1x128xf32, #tpu.memory_space<vmem>>, vector<1x128xf32>
    %cst = arith.constant dense<0.000000e+00> : vector<128x128xf32>
    %4 = tpu.matmul %1, %2, %cst {dimension_numbers = #tpu.dot_dimension_numbers<[1], [0], [0], [1], [0, 0, 1, 1], [], []>} : vector<128x128xbf16>, vector<128x128xbf16>, vector<128x128xf32> -> vector<128x128xf32>
    %5 = vector.broadcast %3 : vector<1x128xf32> to vector<128x128xf32>
    %6 = arith.addf %4, %5 : vector<128x128xf32>
    %cst_6 = arith.constant 0.000000e+00 : f32
    %7 = vector.broadcast %cst_6 : f32 to vector<128x128xf32>
    %8 = arith.maximumf %6, %7 : vector<128x128xf32>
    %c24 = arith.constant 24 : index
    %c0_7 = arith.constant 0 : index
    %9 = vector.load %arg12[%c24, %c0_7] : memref<176x128xf32, #tpu.memory_space<vmem>>, vector<128x128xf32>
    tpu.vector_store %arg12[%c24, %c0_7], %8 {strides = array<i32>} : memref<176x128xf32, #tpu.memory_space<vmem>>, vector<128x128xf32>,
    %c0_i32 = arith.constant 0 : i32
    %10 = arith.cmpi sgt, %arg1, %c0_i32 : i32
    %11 = arith.extui %10 : i1 to i32
    %12 = arith.sitofp %11 : i32 to f32
    %c1_i32 = arith.constant 1 : i32
    %13 = arith.cmpi slt, %arg1, %c1_i32 : i32
    %14 = arith.extui %13 : i1 to i32
    %15 = arith.sitofp %14 : i32 to f32
    %c0_8 = arith.constant 0 : index
    %c0_9 = arith.constant 0 : index
    %c0_10 = arith.constant 0 : index
    %16 = vector.load %arg3[%c0_8, %c0_9, %c0_10] : memref<1x16x128xbf16, #tpu.memory_space<vmem>>, vector<1x16x128xbf16>
    %17 = vector.shape_cast %16 : vector<1x16x128xbf16> to vector<16x128xbf16>
    %cst_11 = arith.constant dense<0.000000e+00> : vector<16x128xf32>
    %18 = tpu.matmul %17, %2, %cst_11 {dimension_numbers = #tpu.dot_dimension_numbers<[1], [0], [0], [1], [0, 0, 1, 1], [], []>} : vector<16x128xbf16>, vector<128x128xbf16>, vector<16x128xf32> -> vector<16x128xf32>
    %c0_12 = arith.constant 0 : index
    %c0_13 = arith.constant 0 : index
    %c0_14 = arith.constant 0 : index
    %19 = vector.load %arg4[%c0_12, %c0_13, %c0_14] : memref<1x16x128xbf16, #tpu.memory_space<vmem>>, vector<1x16x128xbf16>
    %20 = vector.shape_cast %19 : vector<1x16x128xbf16> to vector<16x128xbf16>
    %cst_15 = arith.constant dense<0.000000e+00> : vector<16x128xf32>
    %21 = tpu.matmul %20, %2, %cst_15 {dimension_numbers = #tpu.dot_dimension_numbers<[1], [0], [0], [1], [0, 0, 1, 1], [], []>} : vector<16x128xbf16>, vector<128x128xbf16>, vector<16x128xf32> -> vector<16x128xf32>
    %22 = vector.broadcast %3 : vector<1x128xf32> to vector<16x128xf32>
    %23 = arith.addf %18, %22 : vector<16x128xf32>
    %cst_16 = arith.constant 0.000000e+00 : f32
    %24 = vector.broadcast %cst_16 : f32 to vector<16x128xf32>
    %25 = arith.maximumf %23, %24 : vector<16x128xf32>
    %26 = vector.broadcast %12 : f32 to vector<16x128xf32>
    %27 = arith.mulf %25, %26 : vector<16x128xf32>
    %c8 = arith.constant 8 : index
    %c0_17 = arith.constant 0 : index
    %28 = vector.load %arg12[%c8, %c0_17] : memref<176x128xf32, #tpu.memory_space<vmem>>, vector<16x128xf32>
    tpu.vector_store %arg12[%c8, %c0_17], %27 {strides = array<i32>} : memref<176x128xf32, #tpu.memory_space<vmem>>, vector<16x128xf32>,
    %29 = vector.broadcast %3 : vector<1x128xf32> to vector<16x128xf32>
    %30 = arith.addf %21, %29 : vector<16x128xf32>
    %cst_18 = arith.constant 0.000000e+00 : f32
    %31 = vector.broadcast %cst_18 : f32 to vector<16x128xf32>
    %32 = arith.maximumf %30, %31 : vector<16x128xf32>
    %33 = vector.broadcast %15 : f32 to vector<16x128xf32>
    %34 = arith.mulf %32, %33 : vector<16x128xf32>
    %c152 = arith.constant 152 : index
    %c0_19 = arith.constant 0 : index
    %35 = vector.load %arg12[%c152, %c0_19] : memref<176x128xf32, #tpu.memory_space<vmem>>, vector<16x128xf32>
    tpu.vector_store %arg12[%c152, %c0_19], %34 {strides = array<i32>} : memref<176x128xf32, #tpu.memory_space<vmem>>, vector<16x128xf32>,
    %36 = tpu.iota {dimensions = array<i32: 0>} : vector<128x1xi32>
    %c16_i32 = arith.constant 16 : i32
    %c0_i32_20 = arith.constant 0 : i32
    %37 = arith.cmpi eq, %c16_i32, %c0_i32_20 : i32
    %c1_i32_21 = arith.constant 1 : i32
    %38 = arith.select %37, %c1_i32_21, %c16_i32 : i32
    %39 = vector.broadcast %38 : i32 to vector<128x1xi32>
    %40 = arith.remsi %36, %39 : vector<128x1xi32>
    %c0_i32_22 = arith.constant 0 : i32
    %41 = vector.broadcast %c0_i32_22 : i32 to vector<128x1xi32>
    %42 = arith.cmpi ne, %40, %41 : vector<128x1xi32>
    %c0_i32_23 = arith.constant 0 : i32
    %43 = vector.broadcast %c0_i32_23 : i32 to vector<128x1xi32>
    %44 = arith.cmpi slt, %40, %43 : vector<128x1xi32>
    %c0_i32_24 = arith.constant 0 : i32
    %45 = arith.cmpi slt, %38, %c0_i32_24 : i32
    %46 = vector.broadcast %45 : i1 to vector<128x1xi1>
    %47 = vector.broadcast %46 : vector<128x1xi1> to vector<128x1xi1>
    %48 = arith.xori %44, %47 : vector<128x1xi1>
    %49 = arith.andi %48, %42 : vector<128x1xi1>
    %50 = vector.broadcast %38 : i32 to vector<128x1xi32>
    %51 = arith.addi %40, %50 : vector<128x1xi32>
    %52 = arith.select %49, %51, %40 : vector<128x1xi1>, vector<128x1xi32>
    %c0_i32_25 = arith.constant 0 : i32
    %53 = vector.broadcast %c0_i32_25 : i32 to vector<128x1xi32>
    %54 = arith.cmpi ne, %52, %53 : vector<128x1xi32>
    %c15_i32 = arith.constant 15 : i32
    %55 = vector.broadcast %c15_i32 : i32 to vector<128x1xi32>
    %56 = arith.cmpi ne, %52, %55 : vector<128x1xi32>
    %c7 = arith.constant 7 : index
    %c0_26 = arith.constant 0 : index
    %57 = vector.load %arg12[%c7, %c0_26] : memref<176x128xf32, #tpu.memory_space<vmem>>, vector<128x128xf32>
    %cst_27 = arith.constant 0.000000e+00 : f32
    %58 = vector.shape_cast %54 : vector<128x1xi1> to vector<128x1xi1>
    %59 = vector.broadcast %58 : vector<128x1xi1> to vector<128x128xi1>
    %60 = vector.broadcast %cst_27 : f32 to vector<128x128xf32>
    %61 = arith.select %59, %57, %60 : vector<128x128xi1>, vector<128x128xf32>
    %62 = arith.truncf %61 : vector<128x128xf32> to vector<128x128xbf16>
    %c0_28 = arith.constant 0 : index
    %c0_29 = arith.constant 0 : index
    %63 = vector.load %arg13[%c0_28, %c0_29] : memref<128x1152xbf16, #tpu.memory_space<vmem>>, vector<128x128xbf16>
    tpu.vector_store %arg13[%c0_28, %c0_29], %62 {strides = array<i32>} : memref<128x1152xbf16, #tpu.memory_space<vmem>>, vector<128x128xbf16>,
    %c8_30 = arith.constant 8 : index
    %c0_31 = arith.constant 0 : index
    %64 = vector.load %arg12[%c8_30, %c0_31] : memref<176x128xf32, #tpu.memory_space<vmem>>, vector<128x128xf32>
    %65 = arith.truncf %64 : vector<128x128xf32> to vector<128x128xbf16>
    %c0_32 = arith.constant 0 : index
    %c128 = arith.constant 128 : index
    %66 = vector.load %arg13[%c0_32, %c128] : memref<128x1152xbf16, #tpu.memory_space<vmem>>, vector<128x128xbf16>
    tpu.vector_store %arg13[%c0_32, %c128], %65 {strides = array<i32>} : memref<128x1152xbf16, #tpu.memory_space<vmem>>, vector<128x128xbf16>,
    %c9 = arith.constant 9 : index
    %c0_33 = arith.constant 0 : index
    %67 = vector.load %arg12[%c9, %c0_33] : memref<176x128xf32, #tpu.memory_space<vmem>>, vector<128x128xf32>
    %cst_34 = arith.constant 0.000000e+00 : f32
    %68 = vector.shape_cast %56 : vector<128x1xi1> to vector<128x1xi1>
    %69 = vector.broadcast %68 : vector<128x1xi1> to vector<128x128xi1>
    %70 = vector.broadcast %cst_34 : f32 to vector<128x128xf32>
    %71 = arith.select %69, %67, %70 : vector<128x128xi1>, vector<128x128xf32>
    %72 = arith.truncf %71 : vector<128x128xf32> to vector<128x128xbf16>
    %c0_35 = arith.constant 0 : index
    %c256 = arith.constant 256 : index
    %73 = vector.load %arg13[%c0_35, %c256] : memref<128x1152xbf16, #tpu.memory_space<vmem>>, vector<128x128xbf16>
    tpu.vector_store %arg13[%c0_35, %c256], %72 {strides = array<i32>} : memref<128x1152xbf16, #tpu.memory_space<vmem>>, vector<128x128xbf16>,
    %c23 = arith.constant 23 : index
    %c0_36 = arith.constant 0 : index
    %74 = vector.load %arg12[%c23, %c0_36] : memref<176x128xf32, #tpu.memory_space<vmem>>, vector<128x128xf32>
    %cst_37 = arith.constant 0.000000e+00 : f32
    %75 = vector.shape_cast %54 : vector<128x1xi1> to vector<128x1xi1>
    %76 = vector.broadcast %75 : vector<128x1xi1> to vector<128x128xi1>
    %77 = vector.broadcast %cst_37 : f32 to vector<128x128xf32>
    %78 = arith.select %76, %74, %77 : vector<128x128xi1>, vector<128x128xf32>
    %79 = arith.truncf %78 : vector<128x128xf32> to vector<128x128xbf16>
    %c0_38 = arith.constant 0 : index
    %c384 = arith.constant 384 : index
    %80 = vector.load %arg13[%c0_38, %c384] : memref<128x1152xbf16, #tpu.memory_space<vmem>>, vector<128x128xbf16>
    tpu.vector_store %arg13[%c0_38, %c384], %79 {strides = array<i32>} : memref<128x1152xbf16, #tpu.memory_space<vmem>>, vector<128x128xbf16>,
    %c24_39 = arith.constant 24 : index
    %c0_40 = arith.constant 0 : index
    %81 = vector.load %arg12[%c24_39, %c0_40] : memref<176x128xf32, #tpu.memory_space<vmem>>, vector<128x128xf32>
    %82 = arith.truncf %81 : vector<128x128xf32> to vector<128x128xbf16>
    %c0_41 = arith.constant 0 : index
    %c512 = arith.constant 512 : index
    %83 = vector.load %arg13[%c0_41, %c512] : memref<128x1152xbf16, #tpu.memory_space<vmem>>, vector<128x128xbf16>
    tpu.vector_store %arg13[%c0_41, %c512], %82 {strides = array<i32>} : memref<128x1152xbf16, #tpu.memory_space<vmem>>, vector<128x128xbf16>,
    %c25 = arith.constant 25 : index
    %c0_42 = arith.constant 0 : index
    %84 = vector.load %arg12[%c25, %c0_42] : memref<176x128xf32, #tpu.memory_space<vmem>>, vector<128x128xf32>
    %cst_43 = arith.constant 0.000000e+00 : f32
    %85 = vector.shape_cast %56 : vector<128x1xi1> to vector<128x1xi1>
    %86 = vector.broadcast %85 : vector<128x1xi1> to vector<128x128xi1>
    %87 = vector.broadcast %cst_43 : f32 to vector<128x128xf32>
    %88 = arith.select %86, %84, %87 : vector<128x128xi1>, vector<128x128xf32>
    %89 = arith.truncf %88 : vector<128x128xf32> to vector<128x128xbf16>
    %c0_44 = arith.constant 0 : index
    %c640 = arith.constant 640 : index
    %90 = vector.load %arg13[%c0_44, %c640] : memref<128x1152xbf16, #tpu.memory_space<vmem>>, vector<128x128xbf16>
    tpu.vector_store %arg13[%c0_44, %c640], %89 {strides = array<i32>} : memref<128x1152xbf16, #tpu.memory_space<vmem>>, vector<128x128xbf16>,
    %c39 = arith.constant 39 : index
    %c0_45 = arith.constant 0 : index
    %91 = vector.load %arg12[%c39, %c0_45] : memref<176x128xf32, #tpu.memory_space<vmem>>, vector<128x128xf32>
    %cst_46 = arith.constant 0.000000e+00 : f32
    %92 = vector.shape_cast %54 : vector<128x1xi1> to vector<128x1xi1>
    %93 = vector.broadcast %92 : vector<128x1xi1> to vector<128x128xi1>
    %94 = vector.broadcast %cst_46 : f32 to vector<128x128xf32>
    %95 = arith.select %93, %91, %94 : vector<128x128xi1>, vector<128x128xf32>
    %96 = arith.truncf %95 : vector<128x128xf32> to vector<128x128xbf16>
    %c0_47 = arith.constant 0 : index
    %c768 = arith.constant 768 : index
    %97 = vector.load %arg13[%c0_47, %c768] : memref<128x1152xbf16, #tpu.memory_space<vmem>>, vector<128x128xbf16>
    tpu.vector_store %arg13[%c0_47, %c768], %96 {strides = array<i32>} : memref<128x1152xbf16, #tpu.memory_space<vmem>>, vector<128x128xbf16>,
    %c40 = arith.constant 40 : index
    %c0_48 = arith.constant 0 : index
    %98 = vector.load %arg12[%c40, %c0_48] : memref<176x128xf32, #tpu.memory_space<vmem>>, vector<128x128xf32>
    %99 = arith.truncf %98 : vector<128x128xf32> to vector<128x128xbf16>
    %c0_49 = arith.constant 0 : index
    %c896 = arith.constant 896 : index
    %100 = vector.load %arg13[%c0_49, %c896] : memref<128x1152xbf16, #tpu.memory_space<vmem>>, vector<128x128xbf16>
    tpu.vector_store %arg13[%c0_49, %c896], %99 {strides = array<i32>} : memref<128x1152xbf16, #tpu.memory_space<vmem>>, vector<128x128xbf16>,
    %c41 = arith.constant 41 : index
    %c0_50 = arith.constant 0 : index
    %101 = vector.load %arg12[%c41, %c0_50] : memref<176x128xf32, #tpu.memory_space<vmem>>, vector<128x128xf32>
    %cst_51 = arith.constant 0.000000e+00 : f32
    %102 = vector.shape_cast %56 : vector<128x1xi1> to vector<128x1xi1>
    %103 = vector.broadcast %102 : vector<128x1xi1> to vector<128x128xi1>
    %104 = vector.broadcast %cst_51 : f32 to vector<128x128xf32>
    %105 = arith.select %103, %101, %104 : vector<128x128xi1>, vector<128x128xf32>
    %106 = arith.truncf %105 : vector<128x128xf32> to vector<128x128xbf16>
    %c0_52 = arith.constant 0 : index
    %c1024 = arith.constant 1024 : index
    %107 = vector.load %arg13[%c0_52, %c1024] : memref<128x1152xbf16, #tpu.memory_space<vmem>>, vector<128x128xbf16>
    tpu.vector_store %arg13[%c0_52, %c1024], %106 {strides = array<i32>} : memref<128x1152xbf16, #tpu.memory_space<vmem>>, vector<128x128xbf16>,
    %c0_53 = arith.constant 0 : index
    %c0_54 = arith.constant 0 : index
    %108 = vector.load %arg13[%c0_53, %c0_54] : memref<128x1152xbf16, #tpu.memory_space<vmem>>, vector<128x1152xbf16>
    %c0_55 = arith.constant 0 : index
    %c0_56 = arith.constant 0 : index
    %109 = vector.load %arg7[%c0_55, %c0_56] : memref<1152x128xbf16, #tpu.memory_space<vmem>>, vector<1152x128xbf16>
    %cst_57 = arith.constant dense<0.000000e+00> : vector<128x128xf32>
    %110 = tpu.matmul %108, %109, %cst_57 {dimension_numbers = #tpu.dot_dimension_numbers<[1], [0], [0], [1], [0, 0, 1, 1], [], []>} : vector<128x1152xbf16>, vector<1152x128xbf16>, vector<128x128xf32> -> vector<128x128xf32>
    %c0_58 = arith.constant 0 : index
    %c0_59 = arith.constant 0 : index
    %111 = vector.load %arg8[%c0_58, %c0_59] : memref<1x128xf32, #tpu.memory_space<vmem>>, vector<1x128xf32>
    %112 = vector.broadcast %111 : vector<1x128xf32> to vector<128x128xf32>
    %113 = arith.addf %110, %112 : vector<128x128xf32>
    %cst_60 = arith.constant 0.000000e+00 : f32
    %114 = vector.broadcast %cst_60 : f32 to vector<128x128xf32>
    %115 = arith.maximumf %113, %114 : vector<128x128xf32>
    %116 = arith.truncf %115 : vector<128x128xf32> to vector<128x128xbf16>
    %c0_61 = arith.constant 0 : index
    %c0_62 = arith.constant 0 : index
    %117 = vector.load %arg9[%c0_61, %c0_62] : memref<128x128xbf16, #tpu.memory_space<vmem>>, vector<128x128xbf16>
    %cst_63 = arith.constant dense<0.000000e+00> : vector<128x128xf32>
    %118 = tpu.matmul %116, %117, %cst_63 {dimension_numbers = #tpu.dot_dimension_numbers<[1], [0], [0], [1], [0, 0, 1, 1], [], []>} : vector<128x128xbf16>, vector<128x128xbf16>, vector<128x128xf32> -> vector<128x128xf32>
    %c0_64 = arith.constant 0 : index
    %c0_65 = arith.constant 0 : index
    %119 = vector.load %arg10[%c0_64, %c0_65] : memref<1x128xf32, #tpu.memory_space<vmem>>, vector<1x128xf32>
    %120 = vector.broadcast %119 : vector<1x128xf32> to vector<128x128xf32>
    %121 = arith.addf %118, %120 : vector<128x128xf32>
    %122 = arith.extf %1 : vector<128x128xbf16> to vector<128x128xf32>
    %123 = arith.addf %121, %122 : vector<128x128xf32>
    %cst_66 = arith.constant 0.000000e+00 : f32
    %124 = vector.broadcast %cst_66 : f32 to vector<128x128xf32>
    %125 = arith.maximumf %123, %124 : vector<128x128xf32>
    %126 = arith.truncf %125 : vector<128x128xf32> to vector<128x128xbf16>
    %c0_67 = arith.constant 0 : index
    %c0_68 = arith.constant 0 : index
    %c0_69 = arith.constant 0 : index
    %127 = vector.load %arg11[%c0_67, %c0_68, %c0_69] : memref<1x128x128xbf16, #tpu.memory_space<vmem>>, vector<1x128x128xbf16>
    %128 = vector.shape_cast %127 : vector<1x128x128xbf16> to vector<128x128xbf16>
    %129 = vector.shape_cast %126 : vector<128x128xbf16> to vector<1x128x128xbf16>
    tpu.vector_store %arg11[%c0_67, %c0_68, %c0_69], %129 {strides = array<i32>} : memref<1x128x128xbf16, #tpu.memory_space<vmem>>, vector<1x128x128xbf16>,
    return
  }
  func.func @transform_0(%arg0: i32, %arg1: i32) -> (i32, i32, i32) {
    %c0_i32 = arith.constant 0 : i32
    %c0_i32_0 = arith.constant 0 : i32
    return %arg0, %arg1, %c0_i32 : i32, i32, i32
  }
  func.func @transform_1(%arg0: i32, %arg1: i32) -> (i32, i32, i32) {
    %c8_i32 = arith.constant 8 : i32
    %0 = arith.muli %arg1, %c8_i32 : i32
    %c1_i32 = arith.constant 1 : i32
    %1 = arith.subi %0, %c1_i32 : i32
    %c0_i32 = arith.constant 0 : i32
    %2 = arith.maxsi %1, %c0_i32 : i32
    %c0_i32_0 = arith.constant 0 : i32
    %c0_i32_1 = arith.constant 0 : i32
    return %arg0, %2, %c0_i32_0 : i32, i32, i32
  }
  func.func @transform_2(%arg0: i32, %arg1: i32) -> (i32, i32, i32) {
    %c1_i32 = arith.constant 1 : i32
    %0 = arith.addi %arg1, %c1_i32 : i32
    %c8_i32 = arith.constant 8 : i32
    %1 = arith.muli %0, %c8_i32 : i32
    %c15_i32 = arith.constant 15 : i32
    %2 = arith.minsi %1, %c15_i32 : i32
    %c0_i32 = arith.constant 0 : i32
    %c0_i32_0 = arith.constant 0 : i32
    return %arg0, %2, %c0_i32 : i32, i32, i32
  }
  func.func @transform_3(%arg0: i32, %arg1: i32) -> (i32, i32) {
    %c0_i32 = arith.constant 0 : i32
    %c0_i32_0 = arith.constant 0 : i32
    %c0_i32_1 = arith.constant 0 : i32
    return %c0_i32, %c0_i32_0 : i32, i32
  }
  func.func @transform_4(%arg0: i32, %arg1: i32) -> (i32, i32) {
    %c0_i32 = arith.constant 0 : i32
    %c0_i32_0 = arith.constant 0 : i32
    %c0_i32_1 = arith.constant 0 : i32
    return %c0_i32, %c0_i32_0 : i32, i32
  }
  func.func @transform_5(%arg0: i32, %arg1: i32) -> (i32, i32) {
    %c0_i32 = arith.constant 0 : i32
    %c0_i32_0 = arith.constant 0 : i32
    %c0_i32_1 = arith.constant 0 : i32
    return %c0_i32, %c0_i32_0 : i32, i32
  }
  func.func @transform_6(%arg0: i32, %arg1: i32) -> (i32, i32) {
    %c0_i32 = arith.constant 0 : i32
    %c0_i32_0 = arith.constant 0 : i32
    %c0_i32_1 = arith.constant 0 : i32
    return %c0_i32, %c0_i32_0 : i32, i32
  }
  func.func @transform_7(%arg0: i32, %arg1: i32) -> (i32, i32) {
    %c0_i32 = arith.constant 0 : i32
    %c0_i32_0 = arith.constant 0 : i32
    %c0_i32_1 = arith.constant 0 : i32
    return %c0_i32, %c0_i32_0 : i32, i32
  }
  func.func @transform_8(%arg0: i32, %arg1: i32) -> (i32, i32) {
    %c0_i32 = arith.constant 0 : i32
    %c0_i32_0 = arith.constant 0 : i32
    %c0_i32_1 = arith.constant 0 : i32
    return %c0_i32, %c0_i32_0 : i32, i32
  }
  func.func @transform_9(%arg0: i32, %arg1: i32) -> (i32, i32, i32) {
    %c0_i32 = arith.constant 0 : i32
    %c0_i32_0 = arith.constant 0 : i32
    return %arg0, %arg1, %c0_i32 : i32, i32, i32
  }
}

</mosaic_0001>

<bundles_post_ra>
// kernel: _lambda_.1
= control target key start
LH: loop header
LB: loop body
LE: loop exit
PB: predicated region body
PF: predicated region fallthrough
CT: control target
= control target key end

     0   :  { %s5367_s0 = inlined_call_operand.vmem [shape: bf16[2,256,128], index: 0, kind: input, shape index: {}, may-alias: {0,1,2}]   ;;  %s5368_s1 = inlined_call_operand.vmem [shape: bf16[2,256,128], index: 1, kind: input, shape index: {}, may-alias: {0,1,2}]   ;;  %s5369_s2 = inlined_call_operand.vmem [shape: bf16[2,256,128], index: 2, kind: input, shape index: {}, may-alias: {0,1,2}]   ;;  %s5370_s3 = inlined_call_operand.vmem [shape: bf16[128,128], index: 3, kind: input, shape index: {}]   ;;  %s5371_s4 = inlined_call_operand.vmem [shape: f32[1,128], index: 4, kind: input, shape index: {}]   ;;  %s5372_s5 = inlined_call_operand.vmem [shape: bf16[1152,128], index: 5, kind: input, shape index: {}]   ;;  %s5373_s6 = inlined_call_operand.vmem [shape: f32[1,128], index: 6, kind: input, shape index: {}]   ;;  %s5374_s7 = inlined_call_operand.vmem [shape: bf16[128,128], index: 7, kind: input, shape index: {}]   ;;  %s5375_s8 = inlined_call_operand.vmem [shape: f32[1,128], index: 8, kind: input, shape index: {}]   ;;  %s5376_s9 = inlined_call_operand.hbm [shape: bf16[2,256,128], index: 9, kind: output, shape index: {}]  }
   0x1   :  { %5384 = sst [smem:[#allocation12_spill]] %s5367_s0 }
   0x2   :  { %14 = vsyncpa [#allocation5], 0 }
   0x3   :  { %16 = vsyncpa [#allocation5 + $0x1], 0  ;;  %s4332_s30 = smov 0   ;;  %s4334_s10 = smov 0  }
   0x4   :  { %s4336_s11 = smov 0   ;;  %s4338_s12 = smov 0  }
   0x5   :  { %s4340_s13 = smov 0   ;;  %s4342_s14 = smov 0  }
   0x6   :  { %s4344_s15 = smov 0   ;;  %s4346_s16 = smov 0  }
   0x7 LB: > { %5385 = sst [smem:[#allocation7_spill]] %s4266_s14  ;;  %s3156_s17 = sadd.s32 4294967295, %s4274_s16   ;;  %s4274_s16 = sphi %s4346_s16, %s22_s16   ;;  %s4270_s15 = sphi %s4344_s15, %s5443_s15   ;;  %s4266_s14 = sphi %s4342_s14, %s5442_s14   ;;  %s4262_s13 = sphi %s4340_s13, %s5441_s13   ;;  %s4258_s12 = sphi %s4338_s12, %s5440_s12   ;;  %s4254_s11 = sphi %s4336_s11, %s5446_s11   ;;  %s4250_s10 = sphi %s4334_s10, %s5445_s10   ;;  %s4246_s30 = sphi %s4332_s30, %s5444_s30  }
   0x8   : > { %5386 = sst [smem:[#allocation8_spill]] %s4270_s15  ;;  %s3157_s18 = sadd.s32 4294967294, %s4274_s16  }
   0x9   : > { %s31_s19 = sadd.s32 1, %s4266_s14  ;;  %s34_s20 = sadd.s32 1, %s4270_s15 }
   0xa   : > { %p32_p0 = scmp.ge.s32.totalorder %s31_s19, 2  ;;  %p279_p1 = scmp.ne.s32.totalorder %s4254_s11, %s4250_s10 }
   0xb   : > { %p280_p2 = scmp.eq.s32.totalorder %s3156_s17, 3  ;;  %p285_p5 = scmp.ne.s32.totalorder %s4250_s10, %s4246_s30 }
   0xc   : > { %s5448_s19 = smov (%p32_p0, %s31_s19), 0  ;;  %s5450_s20 = smov (!%p32_p0, %s34_s20), %s4270_s15 }
   0xd   : > { %5387 = sst [smem:[#allocation9_spill]] %s5448_s19  ;;  %s265_s21 = ssub.s32 %s4266_s14, %s5448_s19 }
   0xe   : > { %p4383_p3 = por %p280_p2, %p279_p1  ;;  %p36_p4 = scmp.ge.s32.totalorder %s5450_s20, 2 }
   0xf   : > { %p286_p6 = scmp.eq.s32.totalorder %s3157_s18, 3  ;;  %p3166_p7 = scmp.ge.s32.totalorder %s4274_s16, 1 }
  0x10   : > { %s5452_s20 = smov (%p36_p4, %s5450_s20), 0  ;;  %p377_p9 = scmp.lt.s32.totalorder %s4274_s16, 5 }
  0x11   : > { %5389 = sst [smem:[#allocation10_spill]] %s5452_s20  ;;  %p4392_p8 = por %p286_p6, %p285_p5 }
  0x12   : > { %s264_s24 = ssub.s32 %s4270_s15, %s5452_s20  ;;  %s269_s25 = sadd.s32 1, %s4254_s11 }
  0x13   : > { %s266_s26 = sor.u32 %s265_s21, %s264_s24  ;;  %p378_p10 = pnand %p3166_p7, %p377_p9 }
  0x14   : > { %p267_p11 = scmp.eq.s32.totalorder %s266_s26, 0  ;;  %v4406_v0 = vld [vmem:[%s5370_s3] sm:$0xff] (!%p378_p10)   ;;  %v4276_v1 = vmov (!%p378_p10), 0.0   ;;  %v4412_v2 = vld [vmem:[%s5370_s3 + $0x8] sm:$0xff] (!%p378_p10)   ;;  %s4417_s21 = sshll.u32 (!%p378_p10), %s4258_s12, 4  ;;  %v4426_v3 = vld [vmem:[%s5370_s3 + $0x10] sm:$0xff] (!%p378_p10)   ;;  %v873_v53 = vlaneseq (!%p378_p10) }
  0x15   : > { %381 = sbr.rel (%p378_p10) target bundleno = 896 (0x380), region = 56  ;;  %3870 = vmatprep.subr.bf16.mxu1 (!%p378_p10), %v4276_v1  ;;  %3838 = vmatprep.subr.bf16.mxu0 (!%p378_p10), %v4406_v0  ;;  %p444_p12 = scmp.lt.s32.totalorder (!%p378_p10), %s4262_s13, 1  ;;  %vm4277_vm0 = vmmov (!%p378_p10), 0   ;;  %v4442_v4 = vld [vmem:[%s5370_s3 + $0x18] sm:$0xff] (!%p378_p10)   ;;  %v4459_v6 = vld [vmem:[%s5370_s3 + $0x20] sm:$0xff] (!%p378_p10)   ;;  %v4468_v7 = vld [vmem:[%s5370_s3 + $0x28] sm:$0xff] (!%p378_p10)  }
  0x16   : > { %s4401_s27 = scalar_select %p267_p11, %s4254_s11, %s269_s25  }
  0x17   : > { %3871 = vmatpush3.bf16.msra.mxu1 (!%p378_p10), %v4406_v0  ;;  %3839 = vmatpush3.bf16.msra.mxu0 (!%p378_p10), %v4406_v0  ;;  %p446_p13 = scmp.lt.s32.totalorder (!%p378_p10), %s4417_s21, 31  ;;  %s3171_s25 = sshll.u32 (!%p378_p10), %s4258_s12, 3  ;;  %v4072_v8 = vld [vmem:[%s5370_s3 + $0x30] sm:$0xff] (!%p378_p10)   ;;  %v4073_v9 = vld [vmem:[%s5370_s3 + $0x38] sm:$0xff] (!%p378_p10)   ;;  %v4084_v11 = vld [vmem:[%s5372_s5 + $0x40] sm:$0xff] (!%p378_p10)   ;;  %v4631_v55 = vshrl.u32 (!%p378_p10), %v873_v53, 7 }
  0x18   : > { %5391 = sst [smem:[#allocation11_spill]] %s4401_s27  ;;  %3872 = vmatprep.subr.bf16.mxu1 (!%p378_p10), %v4276_v1  ;;  %3840 = vmatprep.subr.bf16.mxu0 (!%p378_p10), %v4412_v2  ;;  %s3172_s19 = sadd.s32 (!%p378_p10), 4294967295, %s3171_s25  ;;  %v4085_v14 = vld [vmem:[%s5372_s5] sm:$0xff] (!%p378_p10)   ;;  %v4088_v15 = vld [vmem:[%s5372_s5 + $0x48] sm:$0xff] (!%p378_p10)   ;;  %v4092_v18 = vld [vmem:[%s5372_s5 + $0x50] sm:$0xff] (!%p378_p10)   ;;  %vm4278_vm3 = vmmov (!%p378_p10), 1  }
  0x19   : > { %3886 = vmatprep.mubr.msk.bf16.mxu1 (!%p378_p10), %vm4277_vm0, %v4276_v1  ;;  %s5392_s0 = sld [smem:[#allocation12_spill]] (!%p378_p10)  ;;  %p455_p0 = scmp.gt.s32.totalorder (!%p378_p10), %s3172_s19, 0  ;;  %v4089_v16 = vld [vmem:[%s5372_s5 + $0x8] sm:$0xff] (!%p378_p10)   ;;  %v4093_v20 = vld [vmem:[%s5372_s5 + $0x10] sm:$0xff] (!%p378_p10)   ;;  %v4096_v21 = vld [vmem:[%s5372_s5 + $0x58] sm:$0xff] (!%p378_p10)  }
  0x1a   : > { %v4086_v25 = vld [vmem:[%s5372_s5 + $0xc0] sm:$0xff] (!%p378_p10)   ;;  %v4090_v28 = vld [vmem:[%s5372_s5 + $0xc8] sm:$0xff] (!%p378_p10)   ;;  %v4094_v30 = vld [vmem:[%s5372_s5 + $0xd0] sm:$0xff] (!%p378_p10)   ;;  %p755_p5 = scmp.gt.s32.totalorder (!%p378_p10), %s4258_s12, 0  ;;  %p758_p6 = scmp.lt.s32.totalorder (!%p378_p10), %s4258_s12, 1 }
  0x1b   : > { %3873 = vmatpush3.bf16.msra.mxu1 (!%p378_p10), %v4412_v2  ;;  %3841 = vmatpush3.bf16.msra.mxu0 (!%p378_p10), %v4412_v2  ;;  %v4087_v27 = vld [vmem:[%s5372_s5 + $0x80] sm:$0xff] (!%p378_p10)   ;;  %v4091_v29 = vld [vmem:[%s5372_s5 + $0x88] sm:$0xff] (!%p378_p10)   ;;  %v4095_v31 = vld [vmem:[%s5372_s5 + $0x90] sm:$0xff] (!%p378_p10)  }
  0x1c   : > { %s445_s26 = scalar_select %p444_p12, %s4262_s13, 1  ;;  %3874 = vmatprep.subr.bf16.mxu1 %v4276_v1  ;;  %3842 = vmatprep.subr.bf16.mxu0 %v4426_v3  ;;  %v4097_v32 = vld [vmem:[%s5372_s5 + $0x18] sm:$0xff]   ;;  %v4100_v35 = vld [vmem:[%s5372_s5 + $0x60] sm:$0xff]   ;;  %v4104_v39 = vld [vmem:[%s5372_s5 + $0x68] sm:$0xff]  }
  0x1d   : > { %s447_s28 = scalar_select %p446_p13, %s4417_s21, 31  ;;  %v4098_v33 = vld [vmem:[%s5372_s5 + $0xd8] sm:$0xff]   ;;  %v4101_v36 = vld [vmem:[%s5372_s5 + $0x20] sm:$0xff]   ;;  %v4105_v40 = vld [vmem:[%s5372_s5 + $0x28] sm:$0xff]  }
  0x1e   : > { %s4436_s29 = sshll.u32 %s445_s26, 5  ;;  %s3308_s26 = sadd.s32 8, %s3171_s25  ;;  %v4099_v34 = vld [vmem:[%s5372_s5 + $0x98] sm:$0xff]   ;;  %v4102_v37 = vld [vmem:[%s5372_s5 + $0xe0] sm:$0xff]   ;;  %v4106_v41 = vld [vmem:[%s5372_s5 + $0xe8] sm:$0xff]  }
  0x1f   : > { %s449_s24 = sadd.s32 %s4436_s29, %s447_s28  ;;  %3875 = vmatpush3.bf16.msra.mxu1 %v4426_v3  ;;  %3843 = vmatpush3.bf16.msra.mxu0 %v4426_v3  ;;  %s5454_s19 = smov (!%p455_p0, %s3172_s19), 0  ;;  %v4103_v38 = vld [vmem:[%s5372_s5 + $0xa0] sm:$0xff]   ;;  %v4107_v42 = vld [vmem:[%s5372_s5 + $0xa8] sm:$0xff]   ;;  %v4108_v43 = vld [vmem:[%s5372_s5 + $0x70] sm:$0xff]  }
  0x20   : > { %s3170_s20 = sshll.u32 %s449_s24, 2  ;;  %3876 = vmatprep.subr.bf16.mxu1 %v4276_v1  ;;  %3844 = vmatprep.subr.bf16.mxu0 %v4442_v4  ;;  %p473_p1 = scmp.lt.s32.totalorder %s3308_s26, 15  ;;  %v4109_v44 = vld [vmem:[%s5372_s5 + $0x30] sm:$0xff]   ;;  %v4112_v47 = vld [vmem:[%s5372_s5 + $0x78] sm:$0xff]   ;;  %v4116_v51 = vld [vmem:[%s5372_s5 + $0x140] sm:$0xff]  }
  0x21   : > { %s4450_s27 = scalar_lea.vmem %s5392_s0, %s3170_s20  ;;  %s3173_s14 = sshll.u32 %s5454_s19, 1  ;;  %v4110_v45 = vld [vmem:[%s5372_s5 + $0xf0] sm:$0xff]   ;;  %v4113_v48 = vld [vmem:[%s5372_s5 + $0x38] sm:$0xff]   ;;  %v4124_v52 = vld [vmem:[%s5372_s5 + $0x1c0] sm:$0xff]  }
  0x22   : > { %v491_v5 = vld [vmem:[%s4450_s27] sm:$0xff]   ;;  %p460_p2 = scmp.lt.s32.totalorder %s3173_s14, 31  ;;  %s5456_s26 = smov (!%p473_p1, %s3308_s26), 15  ;;  %v493_v10 = vld [vmem:[%s4450_s27 + $0x8] sm:$0xff]   ;;  %v495_v12 = vld [vmem:[%s4450_s27 + $0x10] sm:$0xff]  }
  0x23   : > { %3877 = vmatpush3.bf16.msra.mxu1 %v4442_v4  ;;  %3854 = vmatprep.mubr.bf16.mxu0 %v491_v5  ;;  %s3177_s18 = sshll.u32 %s5456_s26, 1  ;;  %v497_v17 = vld [vmem:[%s4450_s27 + $0x18] sm:$0xff]   ;;  %v499_v19 = vld [vmem:[%s4450_s27 + $0x20] sm:$0xff]   ;;  %v501_v22 = vld [vmem:[%s4450_s27 + $0x28] sm:$0xff]   ;;  %v875_v5 = vadd.s32 8, %v4631_v55 }
  0x24   : > { %3845 = vmatpush3.bf16.msra.mxu0 %v4442_v4  ;;  %3878 = vmatprep.subr.bf16.mxu1 %v4276_v1  ;;  %s5458_s14 = smov (!%p460_p2, %s3173_s14), 31  ;;  %p478_p4 = scmp.lt.s32.totalorder %s3177_s18, 31  ;;  %v503_v23 = vld [vmem:[%s4450_s27 + $0x30] sm:$0xff]   ;;  %v505_v24 = vld [vmem:[%s4450_s27 + $0x38] sm:$0xff]   ;;  %v4629_v54 = vld [vmem:[%s5371_s4] ss:$0 sm:$0xff] }
  0x25   : > { %3846 = vmatprep.subr.bf16.mxu0 %v4459_v6  ;;  %s463_s19 = sadd.s32 %s4436_s29, %s5458_s14  ;;  %v4111_v46 = vld [vmem:[%s5372_s5 + $0xb0] sm:$0xff]   ;;  %v4114_v49 = vld [vmem:[%s5372_s5 + $0xf8] sm:$0xff]  }
  0x26   : > { %s3175_s28 = sshll.u32 %s463_s19, 2  ;;  %s5460_s18 = smov (!%p478_p4, %s3177_s18), 31  ;;  %v4115_v50 = vld [vmem:[%s5372_s5 + $0xb8] sm:$0xff]  }
  0x27   : > { %3879 = vmatpush3.bf16.msra.mxu1 %v4459_v6  ;;  %s465_s20 = scalar_lea.vmem %s5368_s1, %s3175_s28  ;;  %s481_s24 = sadd.s32 %s4436_s29, %s5460_s18 }
  0x28   : > { %3847 = vmatpush3.bf16.msra.mxu0 %v4459_v6  ;;  %3880 = vmatprep.subr.bf16.mxu1 %v4276_v1  ;;  %s4489_s19 = sshll.u32 %s481_s24, 2  ;;  %v4075_v13 = vld [vmem:[%s465_s20] sm:$0xff]   ;;  %s4279_s20 = smov [#allocation4]  }
  0x29   : > { %3848 = vmatprep.subr.bf16.mxu0 %v4468_v7  ;;  %s483_s0 = scalar_lea.vmem %s5369_s2, %s4489_s19  ;;  %s4184_s17 = sshll.u32 %s4279_s20, 4  ;;  %s4185_s17 = int_to_ptr.vmem [resolvable:$false] %s4184_s17 }
  0x2a   : > { %v4083_v26 = vld [vmem:[%s483_s0] sm:$0xff]   ;;  %s756_s29 = scalar_select %p755_p5, 1, 0 }
  0x2b   : > { %3881 = vmatpush3.bf16.msra.mxu1 %v4468_v7  ;;  %s4769_s26 = scalar_select %p758_p6, 1, 0 }
  0x2c   : > { %3849 = vmatpush3.bf16.msra.mxu0 %v4468_v7  ;;  %3882 = vmatprep.subr.bf16.mxu1 %v4276_v1  ;;  %s757_s14 = scvt.s32.f32 %s756_s29  ;;  %s440_s29 = sand.u32 1, %s4250_s10  }
  0x2d   : > { %3850 = vmatprep.subr.bf16.mxu0 %v4072_v8  ;;  %s760_s28 = scvt.s32.f32 %s4769_s26  ;;  %s3167_s18 = sshll.u32 %s440_s29, 6 }
  0x2e   : > { %v814_v60 = vstv %s757_s14  ;;  %s5279_s26 = scalar_lea.vmem [#allocation4], %s3167_s18  ;;  %s3299_s14 = sshll.u32 %s4262_s13, 5 }
  0x2f   : > { %3883 = vmatpush3.bf16.msra.mxu1 %v4072_v8  ;;  %s3038_s0 = sshll.u32 %s5279_s26, 4  ;;  %s5315_s24 = scalar_lea.sflag [#allocation5], %s440_s29  ;;  %s5309_s0 = int_to_ptr.vmem [resolvable:$true] %s3038_s0 }
  0x30   : > { %3851 = vmatpush3.bf16.msra.mxu0 %v4072_v8  ;;  %3884 = vmatprep.subr.bf16.mxu1 %v4276_v1  ;;  %s4180_s25 = scalar_lea.vmem %s5309_s0, 1024  ;;  %p4187_p11 = scmp.lt.s32.totalorder %s5309_s0, %s4185_s17 }
  0x31   : > { %3852 = vmatprep.subr.bf16.mxu0 %v4073_v9  ;;  %p4181_p7 = scmp.ne.s32.totalorder %s5309_s0, %s4180_s25 }
  0x33   : > { %3885 = vmatpush3.bf16.msra.mxu1 %v4073_v9  ;;  %p4182_p9 = pnand %p4181_p7, %p4383_p3 }
  0x34   : > { %3853 = vmatpush3.bf16.msra.mxu0 %v4073_v9  ;;  %3550 = vmatprep.subr.bf16.mxu1 %v4084_v11 }
  0x35   : > { %3890 = vmatprep.subr.bf16.mxu0 %v4276_v1  ;;  %p4183_p10 = pneg %p4182_p9 }
  0x36   : > { %3887 = vmatmul.mubr.bf16.vlgmr.msra.gmra.mrb[0].mxu1 %v4075_v13 }
  0x37   : > { %3855 = vmatmul.mubr.bf16.vlgmr.msra.gmra.mrb[0].mxu0 %v493_v10  ;;  %3551 = vmatpush3.bf16.msra.mxu1 %v4085_v14  ;;  %v894_v14 = vand.u32 15, %v4631_v55 }
  0x38   : > { %3858 = vmatprep.mubr.bf16.mxu0 %v495_v12  ;;  %3891 = vmatpush3.bf16.msra.mxu0 %v4406_v0 }
  0x39   : > { %3892 = vmatprep.subr.bf16.mxu0 %v4276_v1  ;;  %3552 = vmatprep.subr.bf16.mxu1 %v4088_v15  ;;  %vm1082_vm1 = vcmp.ne.s32.totalorder %v894_v14, 0  ;;  %v879_v14 = vadd.s32 40, %v4631_v55 }
  0x3a   : > { %vm4651_vm4 = vmpackc.low %vm4278_vm3, %vm1082_vm1 }
  0x3b   : > { %3553 = vmatpush3.bf16.msra.mxu1 %v4089_v16 }
  0x3c   : > { %3893 = vmatpush3.bf16.msra.mxu0 %v4412_v2  ;;  %3554 = vmatprep.subr.bf16.mxu1 %v4092_v18  ;;  %v876_v18 = vadd.s32 16, %v4631_v55 }
  0x3d   : > { %3894 = vmatprep.subr.bf16.mxu0 %v4276_v1 }
  0x3f   : > { %3859 = vmatmul.mubr.bf16.gmra.mrb[4].mxu0 %v497_v17  ;;  %3555 = vmatpush3.bf16.msra.mxu1 %v4093_v20  ;;  %v901_v17 = vand.u32 15, %v875_v5 }
  0x40   : > { %3862 = vmatprep.mubr.bf16.mxu0 %v499_v19  ;;  %3895 = vmatpush3.bf16.msra.mxu0 %v4426_v3 }
  0x41   : > { %3896 = vmatprep.subr.bf16.mxu0 %v4276_v1  ;;  %3556 = vmatprep.subr.bf16.mxu1 %v4096_v21  ;;  %vm1099_vm2 = vcmp.ne.s32.totalorder %v901_v17, 15 }
  0x42   : > { %vm4657_vm5 = vmpackc.low %vm1099_vm2, %vm4278_vm3 }
  0x43   : > { %3557 = vmatpush3.bf16.msra.mxu1 %v4097_v32 }
  0x44   : > { %3897 = vmatpush3.bf16.msra.mxu0 %v4442_v4  ;;  %3558 = vmatprep.subr.bf16.mxu1 %v4100_v35 }
  0x45   : > { %3898 = vmatprep.subr.bf16.mxu0 %v4276_v1 }
  0x47   : > { %3863 = vmatmul.mubr.bf16.gmra.mrb[8].mxu0 %v501_v22  ;;  %3559 = vmatpush3.bf16.msra.mxu1 %v4101_v36 }
  0x48   : > { %3866 = vmatprep.mubr.bf16.mxu0 %v503_v23  ;;  %3899 = vmatpush3.bf16.msra.mxu0 %v4459_v6 }
  0x49   : > { %3900 = vmatprep.subr.bf16.mxu0 %v4276_v1  ;;  %3560 = vmatprep.subr.bf16.mxu1 %v4104_v39 }
  0x4b   : > { %3561 = vmatpush3.bf16.msra.mxu1 %v4105_v40  ;;  %v4117_v40 = vld [vmem:[%s5372_s5 + $0x100] sm:$0xff]  }
  0x4c   : > { %3901 = vmatpush3.bf16.msra.mxu0 %v4468_v7  ;;  %3562 = vmatprep.subr.bf16.mxu1 %v4108_v43 }
  0x4d   : > { %3902 = vmatprep.subr.bf16.mxu0 %v4276_v1 }
  0x4f   : > { %3867 = vmatmul.mubr.bf16.gmra.mrb[12].mxu0 %v505_v24  ;;  %3563 = vmatpush3.bf16.msra.mxu1 %v4109_v44 }
  0x50   : > { %3903 = vmatpush3.bf16.msra.mxu0 %v4072_v8  ;;  %3906 = vmatprep.mubr.msk.bf16.mxu0 %vm4277_vm0, %v4276_v1 }
  0x51   : > { %3904 = vmatprep.subr.bf16.mxu0 %v4276_v1  ;;  %3564 = vmatprep.subr.bf16.mxu1 %v4112_v47 }
  0x53   : > { %3565 = vmatpush3.bf16.msra.mxu1 %v4113_v48 }
  0x54   : > { %3905 = vmatpush3.bf16.msra.mxu0 %v4073_v9  ;;  %3678 = vmatprep.subr.bf16.mxu1 %v4116_v51 }
  0x55   : > { %3614 = vmatprep.subr.bf16.mxu0 %v4086_v25 }
  0x57   : > { %3907 = vmatmul.mubr.bf16.vlgmr.msra.gmra.mrb[16].mxu0 %v4083_v26 }
  0x58   : > { %3615 = vmatpush3.bf16.msra.mxu0 %v4087_v27  ;;  %v908_v27 = vand.u32 15, %v876_v18 }
  0x59   : > { %3616 = vmatprep.subr.bf16.mxu0 %v4090_v28 }
  0x5a   : > { %vm4665_vm6 = vcmp.ne.s32.totalorder %v908_v27, 0  ;;  %v4121_v27 = vld [vmem:[%s5372_s5 + $0x110] sm:$0xff]  }
  0x5b   : > { %vm4679_vm7 = vmpackc.low %vm4278_vm3, %vm4665_vm6 }
  0x5c   : > { %3617 = vmatpush3.bf16.msra.mxu0 %v4091_v29 }
  0x5d   : > { %3618 = vmatprep.subr.bf16.mxu0 %v4094_v30 }
  0x60   : > { %3619 = vmatpush3.bf16.msra.mxu0 %v4095_v31 }
  0x61   : > { %3620 = vmatprep.subr.bf16.mxu0 %v4098_v33  ;;  %v4152_v33 = vld [vmem:[%s5372_s5 + $0x220] sm:$0xff]  }
  0x64   : > { %3621 = vmatpush3.bf16.msra.mxu0 %v4099_v34  ;;  %v877_v34 = vadd.s32 24, %v4631_v55 }
  0x65   : > { %3622 = vmatprep.subr.bf16.mxu0 %v4102_v37  ;;  %v878_v37 = vadd.s32 32, %v4631_v55 }
  0x66   : > { %v915_v53 = vand.u32 15, %v877_v34 }
  0x68   : > { %3623 = vmatpush3.bf16.msra.mxu0 %v4103_v38  ;;  %vm4711_vm8 = vcmp.ne.s32.totalorder %v915_v53, 15 }
  0x69   : > { %3624 = vmatprep.subr.bf16.mxu0 %v4106_v41  ;;  %vm4734_vm10 = vmpackc.low %vm4711_vm8, %vm4278_vm3 }
  0x6c   : > { %3625 = vmatpush3.bf16.msra.mxu0 %v4107_v42 }
  0x6d   : > { %3626 = vmatprep.subr.bf16.mxu0 %v4110_v45 }
  0x70   : > { %3627 = vmatpush3.bf16.msra.mxu0 %v4111_v46 }
  0x71   : > { %3628 = vmatprep.subr.bf16.mxu0 %v4114_v49 }
  0x74   : > { %3629 = vmatpush3.bf16.msra.mxu0 %v4115_v50 }
  0x75   : > { %3742 = vmatprep.subr.bf16.mxu0 %v4124_v52 }
 0x109   : > { %v805_v56 = vpop.f32.mrb[0].mxu1 }
 0x10a   : > { %v806_v57 = vadd.f32 %v4629_v54, %v805_v56  ;;  %v3856_v58 = vpop.f32.mrb[0].mxu0  ;;  %v3888_v59 = vpop.f32.mrb[1].mxu1 }
 0x10b   : > { %v669_v61 = vadd.f32 %v3856_v58, %v4629_v54  ;;  %v660_v62 = vpop.f32.mrb[1].mxu0  ;;  %v808_v63 = vpop.f32.mrb[2].mxu1 }
 0x10c   : > { %v812_v0 = vmax.f32 %v806_v57, 0.0  ;;  %v661_v1 = vadd.f32 %v4629_v54, %v660_v62  ;;  %v809_v2 = vadd.f32 %v4629_v54, %v808_v63  ;;  %v3857_v3 = vpop.f32.mrb[2].mxu0  ;;  %v3889_v4 = vpop.f32.mrb[3].mxu1  ;;  %v4118_v62 = vld [vmem:[%s5372_s5 + $0x148] sm:$0xff]   ;;  %v922_v63 = vand.u32 15, %v878_v37  ;;  %v4122_v37 = vld [vmem:[%s5372_s5 + $0x158] sm:$0xff]  }
 0x10d   : > { %v725_v6 = vmax.f32 %v669_v61, 0.0  ;;  %v672_v7 = vadd.f32 %v3857_v3, %v4629_v54  ;;  %v663_v8 = vpop.f32.mrb[3].mxu0  ;;  %v4128_v3 = vld [vmem:[%s5372_s5 + $0x1c8] sm:$0xff]  }
 0x10e   : > { %v815_v9 = vmul.f32 %v814_v60, %v812_v0  ;;  %v723_v10 = vmax.f32 %v661_v1, 0.0  ;;  %v813_v11 = vmax.f32 %v809_v2, 0.0  ;;  %v664_v12 = vadd.f32 %v4629_v54, %v663_v8  ;;  %v4125_v0 = vld [vmem:[%s5372_s5 + $0x180] sm:$0xff]  }
 0x10f   : > { %741 = vst [vmem:[#allocation2 + $0x28] sm:$0xff] %v725_v6  ;;  %v726_v13 = vmax.f32 %v672_v7, 0.0  ;;  %v4119_v7 = vld [vmem:[%s5372_s5 + $0x108] sm:$0xff]   ;;  %vm4718_vm9 = vcmp.ne.s32.totalorder %v922_v63, 0 }
 0x110   : > { %817 = vst [vmem:[#allocation2 + $0x8] sm:$0xff] %v815_v9  ;;  %739 = vst [vmem:[#allocation2 + $0x18] sm:$0xff] %v723_v10  ;;  %v816_v15 = vmul.f32 %v814_v60, %v813_v11  ;;  %v724_v16 = vmax.f32 %v664_v12, 0.0  ;;  %v4120_v11 = vld [vmem:[%s5372_s5 + $0x150] sm:$0xff]  }
 0x111   : > { %742 = vst [vmem:[#allocation2 + $0x30] sm:$0xff] %v726_v13  ;;  %v4642_v19 = vpack.c.bf16 %v726_v13, %v725_v6  ;;  %vm4743_vm11 = vmpackc.low %vm4278_vm3, %vm4718_vm9  ;;  %v4154_v60 = vld [vmem:[%s5372_s5 + $0x230] sm:$0xff]  }
 0x112   : > { %818 = vst [vmem:[#allocation2 + $0x10] sm:$0xff] %v816_v15  ;;  %740 = vst [vmem:[#allocation2 + $0x20] sm:$0xff] %v724_v16  ;;  %v3860_v20 = vpop.f32.mrb[4].mxu0  ;;  %v1210_v21 = vpack.c.bf16 %v816_v15, %v815_v9  ;;  %v4644_v22 = vpack.c.bf16 %v724_v16, %v723_v10  ;;  %v4129_v15 = vld [vmem:[%s5372_s5 + $0x188] sm:$0xff]  }
 0x113   : > { %v685_v23 = vadd.f32 %v3860_v20, %v4629_v54  ;;  %v676_v24 = vpop.f32.mrb[5].mxu0  ;;  %v880_v20 = vadd.s32 48, %v4631_v55 }
 0x114   : > { %v677_v25 = vadd.f32 %v4629_v54, %v676_v24  ;;  %v3861_v26 = vpop.f32.mrb[6].mxu0  ;;  %2249 = vmatprep.mubr.bf16.mxu1 %v1210_v21  ;;  %v4132_v21 = vld [vmem:[%s5372_s5 + $0x1d0] sm:$0xff]  }
 0x115   : > { %v729_v28 = vmax.f32 %v685_v23, 0.0  ;;  %v688_v29 = vadd.f32 %v3861_v26, %v4629_v54  ;;  %v679_v30 = vpop.f32.mrb[7].mxu0 }
 0x116   : > { %v727_v31 = vmax.f32 %v677_v25, 0.0  ;;  %v680_v32 = vadd.f32 %v4629_v54, %v679_v30 }
 0x117   : > { %745 = vst [vmem:[#allocation2 + $0x48] sm:$0xff] %v729_v28  ;;  %v730_v35 = vmax.f32 %v688_v29, 0.0  ;;  %v1114_v39 = vld [vmem:[#allocation2 + $0x7] sm:$0xff] }
 0x118   : > { %743 = vst [vmem:[#allocation2 + $0x38] sm:$0xff] %v727_v31  ;;  %v728_v38 = vmax.f32 %v680_v32, 0.0  ;;  %v1309_v42 = vld [vmem:[#allocation2 + $0x2f] sm:$0xff]  ;;  %v929_v32 = vand.u32 15, %v879_v14 }
 0x119   : > { %746 = vst [vmem:[#allocation2 + $0x50] sm:$0xff] %v730_v35  ;;  %v1306_v43 = vld [vmem:[#allocation2 + $0x17] sm:$0xff]  ;;  %v1307_v44 = vld [vmem:[#allocation2 + $0x1f] sm:$0xff]  ;;  %v1115_v45 = vld [vmem:[#allocation2 + $0xf] sm:$0xff]  ;;  %v4669_v46 = vpack.c.bf16 %v730_v35, %v729_v28 }
 0x11a   : > { %744 = vst [vmem:[#allocation2 + $0x40] sm:$0xff] %v728_v38  ;;  %v4671_v47 = vpack.c.bf16 %v1307_v44, %v1306_v43  ;;  %v3373_v48 = vpack.c.bf16 %v1115_v45, %v1114_v39  ;;  %v1226_v49 = vld [vmem:[#allocation2 + $0x9] sm:$0xff]  ;;  %v1227_v50 = vld [vmem:[#allocation2 + $0x11] sm:$0xff]  ;;  %v3864_v51 = vpop.f32.mrb[8].mxu0  ;;  %v4673_v56 = vpack.c.bf16 %v728_v38, %v727_v31  ;;  %v1228_v17 = vld [vmem:[#allocation2 + $0x19] sm:$0xff]  ;;  %vm4789_vm12 = vcmp.ne.s32.totalorder %v929_v32, 15 }
 0x11b   : > { %v1308_v52 = vld [vmem:[#allocation2 + $0x27] sm:$0xff]  ;;  %v3400_v57 = vpack.c.bf16 %v1227_v50, %v1226_v49  ;;  %v701_v58 = vadd.f32 %v3864_v51, %v4629_v54  ;;  %v692_v59 = vpop.f32.mrb[9].mxu0  ;;  %v4133_v38 = vld [vmem:[%s5372_s5 + $0x190] sm:$0xff]   ;;  %v4134_v43 = vld [vmem:[%s5372_s5 + $0x1d8] sm:$0xff]  }
 0x11c   : > { %v4683_v61 = vpack.c.bf16 %v1309_v42, %v1308_v52  ;;  %3398 = vmatprep.mubr.msk.bf16.mxu0 %vm4651_vm4, %v4671_v47  ;;  %3374 = vmatmul.mubr.msk.bf16.vlgmr.msra.gmra.mrb[4].mxu1 %vm4651_vm4, %v3373_v48  ;;  %v693_v1 = vadd.f32 %v4629_v54, %v692_v59  ;;  %v3865_v2 = vpop.f32.mrb[10].mxu0  ;;  %v1229_v18 = vld [vmem:[#allocation2 + $0x21] sm:$0xff]  ;;  %v936_v42 = vand.u32 15, %v880_v20  ;;  %v4123_v50 = vld [vmem:[%s5372_s5 + $0x118] sm:$0xff]   ;;  %v881_v59 = vadd.s32 56, %v4631_v55  ;;  %v1230_v63 = vld [vmem:[#allocation2 + $0x29] sm:$0xff] }
 0x11d   : > { %3401 = vmatmul.mubr.msk.bf16.vlgmr.msra.gmra.mrb[20].mxu0 %vm4657_vm5, %v3400_v57  ;;  %3679 = vmatpush3.bf16.msra.mxu1 %v4117_v40  ;;  %v733_v4 = vmax.f32 %v701_v58, 0.0  ;;  %v704_v5 = vadd.f32 %v3865_v2, %v4629_v54  ;;  %v695_v6 = vpop.f32.mrb[11].mxu0  ;;  %v4752_v30 = vpack.c.bf16 %v1229_v18, %v1228_v17  ;;  %v4126_v51 = vld [vmem:[%s5372_s5 + $0x160] sm:$0xff]   ;;  %vm4811_vm14 = vmpackc.low %vm4789_vm12, %vm4278_vm3  ;;  %v868_v20 = vstv %s760_s28  ;;  %v4131_v32 = vld [vmem:[%s5372_s5 + $0x128] sm:$0xff]   ;;  %s4186_s28 = scalar_lea.vmem %s4185_s17, 2048 }
 0x11e   : > { %v731_v8 = vmax.f32 %v693_v1, 0.0  ;;  %2257 = vmatprep.mubr.bf16.mxu1 %v4644_v22  ;;  %3404 = vmatprep.mubr.msk.bf16.mxu0 %vm4679_vm7, %v4683_v61  ;;  %v696_v9 = vadd.f32 %v4629_v54, %v695_v6  ;;  %vm4797_vm13 = vcmp.ne.s32.totalorder %v936_v42, 0  ;;  %v943_v13 = vand.u32 15, %v881_v59  ;;  %v4139_v17 = vld [vmem:[%s5372_s5 + $0x1a0] sm:$0xff]   ;;  %v4143_v1 = vld [vmem:[%s5372_s5 + $0x138] sm:$0xff]   ;;  %p4188_p12 = scmp.lt.s32.totalorder %s4186_s28, %s4180_s25 }
 0x11f   : > { %749 = vst [vmem:[#allocation2 + $0x68] sm:$0xff] %v733_v4  ;;  %v734_v12 = vmax.f32 %v704_v5, 0.0  ;;  %3680 = vmatprep.subr.bf16.mxu1 %v4118_v62  ;;  %3743 = vmatpush3.bf16.msra.mxu0 %v4125_v0  ;;  %v1310_v31 = vld [vmem:[#allocation2 + $0x37] sm:$0xff]  ;;  %vm4827_vm15 = vmpackc.low %vm4278_vm3, %vm4797_vm13  ;;  %v4156_v6 = vld [vmem:[%s5374_s7] sm:$0xff]  }
 0x120   : > { %747 = vst [vmem:[#allocation2 + $0x58] sm:$0xff] %v731_v8  ;;  %v732_v16 = vmax.f32 %v696_v9, 0.0  ;;  %3744 = vmatprep.subr.bf16.mxu0 %v4128_v3  ;;  %v1313_v58 = vld [vmem:[#allocation2 + $0x4f] sm:$0xff]  ;;  %v4135_v62 = vld [vmem:[%s5372_s5 + $0x198] sm:$0xff]   ;;  %v882_v3 = vadd.s32 64, %v4631_v55  ;;  %vm4855_vm0 = vcmp.ne.s32.totalorder %v943_v13, 15  ;;  %p4189_p13 = por %p4188_p12, %p4187_p11 }
 0x121   : > { %750 = vst [vmem:[#allocation2 + $0x70] sm:$0xff] %v734_v12  ;;  %3681 = vmatpush3.bf16.msra.mxu1 %v4119_v7  ;;  %v1311_v24 = vld [vmem:[#allocation2 + $0x3f] sm:$0xff]  ;;  %v4738_v25 = vpack.c.bf16 %v734_v12, %v733_v4  ;;  %v1312_v57 = vld [vmem:[#allocation2 + $0x47] sm:$0xff]  ;;  %v1231_v0 = vld [vmem:[#allocation2 + $0x31] sm:$0xff] }
 0x122   : > { %748 = vst [vmem:[#allocation2 + $0x60] sm:$0xff] %v732_v16  ;;  %3682 = vmatprep.subr.bf16.mxu1 %v4120_v11  ;;  %v3868_v28 = vpop.f32.mrb[12].mxu0  ;;  %v4750_v29 = vpack.c.bf16 %v732_v16, %v731_v8  ;;  %v4764_v39 = vpack.c.bf16 %v1311_v24, %v1310_v31  ;;  %v4138_v4 = vld [vmem:[%s5372_s5 + $0x1e0] sm:$0xff]   ;;  %v4815_v7 = vpack.c.bf16 %v1313_v58, %v1312_v57  ;;  %v4130_v16 = vld [vmem:[%s5372_s5 + $0x168] sm:$0xff]   ;;  %v950_v18 = vand.u32 15, %v882_v3  ;;  %vm4878_vm2 = vmpackc.low %vm4855_vm0, %vm4278_vm3  ;;  %p4190_p0 = pnand %p4189_p13, %p4183_p10 }
 0x123   : > { %v717_v34 = vadd.f32 %v3868_v28, %v4629_v54  ;;  %v708_v35 = vpop.f32.mrb[13].mxu0  ;;  %3745 = vmatpush3.bf16.msra.mxu0 %v4129_v15  ;;  %v4127_v8 = vld [vmem:[%s5372_s5 + $0x120] sm:$0xff]   ;;  %v4822_v11 = vpack.c.bf16 %v1231_v0, %v1230_v63  ;;  %v4140_v24 = vld [vmem:[%s5372_s5 + $0x1e8] sm:$0xff]   ;;  %v4142_v57 = vld [vmem:[%s5372_s5 + $0x178] sm:$0xff]  }
 0x124   : > { %3377 = vmatmul.mubr.msk.bf16.gmra.mrb[8].mxu1 %vm4679_vm7, %v4671_v47  ;;  %v709_v40 = vadd.f32 %v4629_v54, %v708_v35  ;;  %v3869_v41 = vpop.f32.mrb[14].mxu0  ;;  %3746 = vmatprep.subr.bf16.mxu0 %v4132_v21  ;;  %v883_v35 = vadd.s32 72, %v4631_v55  ;;  %v1233_v42 = vld [vmem:[#allocation2 + $0x41] sm:$0xff]  ;;  %vm1090_vm1 = vcmp.ne.s32.totalorder %v950_v18, 0  ;;  %v4145_v58 = vld [vmem:[%s5372_s5 + $0x1b0] sm:$0xff]   ;;  %v4146_v0 = vld [vmem:[%s5372_s5 + $0x1f8] sm:$0xff]  }
 0x125   : > { %3407 = vmatmul.mubr.msk.bf16.gmra.mrb[24].mxu0 %vm4734_vm10, %v4752_v30  ;;  %2265 = vmatprep.mubr.bf16.mxu1 %v4642_v19  ;;  %v737_v44 = vmax.f32 %v717_v34, 0.0  ;;  %v720_v45 = vadd.f32 %v3869_v41, %v4629_v54  ;;  %v711_v47 = vpop.f32.mrb[15].mxu0  ;;  %v1232_v41 = vld [vmem:[#allocation2 + $0x39] sm:$0xff]  ;;  %vm4888_vm6 = vmpackc.low %vm4278_vm3, %vm1090_vm1  ;;  %v1234_v13 = vld [vmem:[#allocation2 + $0x49] sm:$0xff] }
 0x126   : > { %3410 = vmatprep.mubr.msk.bf16.mxu0 %vm4743_vm11, %v4764_v39  ;;  %3683 = vmatpush3.bf16.msra.mxu1 %v4121_v27  ;;  %v735_v48 = vmax.f32 %v709_v40, 0.0  ;;  %v712_v49 = vadd.f32 %v4629_v54, %v711_v47  ;;  %v4141_v40 = vld [vmem:[%s5372_s5 + $0x1a8] sm:$0xff]   ;;  %v4160_v12 = vld [vmem:[%s5374_s7 + $0x20] sm:$0xff]  }
 0x127   : > { %753 = vst [vmem:[#allocation2 + $0x88] sm:$0xff] %v737_v44  ;;  %v738_v53 = vmax.f32 %v720_v45, 0.0  ;;  %3684 = vmatprep.subr.bf16.mxu1 %v4122_v37  ;;  %3747 = vmatpush3.bf16.msra.mxu0 %v4133_v38  ;;  %v1314_v45 = vld [vmem:[#allocation2 + $0x57] sm:$0xff] }
 0x128   : > { %751 = vst [vmem:[#allocation2 + $0x78] sm:$0xff] %v735_v48  ;;  %v736_v2 = vmax.f32 %v712_v49, 0.0  ;;  %3748 = vmatprep.subr.bf16.mxu0 %v4134_v43  ;;  %v884_v43 = vadd.s32 80, %v4631_v55 }
 0x129   : > { %754 = vst [vmem:[#allocation2 + $0x90] sm:$0xff] %v738_v53  ;;  %v4806_v5 = vpack.c.bf16 %v738_v53, %v737_v44  ;;  %v4144_v44 = vld [vmem:[%s5372_s5 + $0x1f0] sm:$0xff]   ;;  %v1315_v47 = vld [vmem:[#allocation2 + $0x5f] sm:$0xff]  ;;  %v957_v53 = vand.u32 15, %v883_v35  ;;  %v1316_v3 = vld [vmem:[#allocation2 + $0x67] sm:$0xff] }
 0x12a   : > { %752 = vst [vmem:[#allocation2 + $0x80] sm:$0xff] %v736_v2  ;;  %3685 = vmatpush3.bf16.msra.mxu1 %v4123_v50  ;;  %v859_v9 = vpop.f32.mrb[16].mxu0  ;;  %v4820_v10 = vpack.c.bf16 %v736_v2, %v735_v48  ;;  %v4137_v50 = vld [vmem:[%s5372_s5 + $0x130] sm:$0xff]   ;;  %v964_v63 = vand.u32 15, %v884_v43  ;;  %v4147_v2 = vld [vmem:[%s5372_s5 + $0x1b8] sm:$0xff]  }
 0x12b   : > { %3686 = vmatprep.subr.bf16.mxu1 %v4126_v51  ;;  %v860_v14 = vadd.f32 %v4629_v54, %v859_v9  ;;  %v3908_v15 = vpop.f32.mrb[17].mxu0  ;;  %3749 = vmatpush3.bf16.msra.mxu0 %v4135_v62  ;;  %v4885_v51 = vpack.c.bf16 %v1233_v42, %v1232_v41  ;;  %v4904_v62 = vpack.c.bf16 %v1315_v47, %v1314_v45  ;;  %vm1107_vm8 = vcmp.ne.s32.totalorder %v957_v53, 15  ;;  %v4926_v9 = vld [vmem:[%s5372_s5 + $0x200] sm:$0xff]  }
 0x12c   : > { %3380 = vmatmul.mubr.msk.bf16.gmra.mrb[12].mxu1 %vm4743_vm11, %v4683_v61  ;;  %v862_v21 = vpop.f32.mrb[18].mxu0  ;;  %3750 = vmatprep.subr.bf16.mxu0 %v4138_v4  ;;  %v1317_v4 = vld [vmem:[#allocation2 + $0x6f] sm:$0xff]  ;;  %vm1092_vm9 = vcmp.ne.s32.totalorder %v964_v63, 0  ;;  %v886_v15 = vadd.s32 96, %v4631_v55  ;;  %vm4930_vm12 = vmpackc.low %vm1107_vm8, %vm4278_vm3  ;;  %v889_v47 = vadd.s32 120, %v4631_v55 }
 0x12d   : > { %3413 = vmatmul.mubr.msk.bf16.gmra.mrb[28].mxu0 %vm4811_vm14, %v4822_v11  ;;  %2273 = vmatprep.mubr.bf16.mxu1 %v4673_v56  ;;  %v866_v27 = vmax.f32 %v860_v14, 0.0  ;;  %v863_v28 = vadd.f32 %v4629_v54, %v862_v21  ;;  %v3909_v31 = vpop.f32.mrb[19].mxu0  ;;  %v4136_v54 = vld [vmem:[%s5372_s5 + $0x170] sm:$0xff]   ;;  %vm4939_vm13 = vmpackc.low %vm4278_vm3, %vm1092_vm9 }
 0x12e   : > { %3416 = vmatprep.mubr.msk.bf16.mxu0 %vm4827_vm15, %v4815_v7  ;;  %3687 = vmatpush3.bf16.msra.mxu1 %v4127_v8  ;;  %v885_v8 = vadd.s32 88, %v4631_v55  ;;  %v1235_v14 = vld [vmem:[#allocation2 + $0x51] sm:$0xff]  ;;  %v1237_v31 = vld [vmem:[#allocation2 + $0x61] sm:$0xff] }
 0x12f   : > { %v4860_v37 = vmul.f32 %v868_v20, %v866_v27  ;;  %v867_v38 = vmax.f32 %v863_v28, 0.0  ;;  %3688 = vmatprep.subr.bf16.mxu1 %v4130_v16  ;;  %3751 = vmatpush3.bf16.msra.mxu0 %v4139_v17  ;;  %v4934_v17 = vpack.c.bf16 %v1317_v4, %v1316_v3  ;;  %v4936_v18 = vpack.c.bf16 %v1235_v14, %v1234_v13  ;;  %v1236_v28 = vld [vmem:[#allocation2 + $0x59] sm:$0xff]  ;;  %v1239_v53 = vld [vmem:[#allocation2 + $0x71] sm:$0xff] }
 0x130   : > { %3752 = vmatprep.subr.bf16.mxu0 %v4140_v24  ;;  %v971_v21 = vand.u32 15, %v885_v8  ;;  %v978_v24 = vand.u32 15, %v886_v15  ;;  %v887_v27 = vadd.s32 104, %v4631_v55  ;;  %v1318_v34 = vld [vmem:[#allocation2 + $0x77] sm:$0xff]  ;;  %v1321_v45 = vld [vmem:[#allocation2 + $0x8f] sm:$0xff] }
 0x131   : > { %871 = vst [vmem:[#allocation2 + $0x98] sm:$0xff] %v4860_v37  ;;  %v4873_v48 = vmul.f32 %v868_v20, %v867_v38  ;;  %v5425_v20 = vmov 0  ;;  %v1319_v35 = vld [vmem:[#allocation2 + $0x7f] sm:$0xff]  ;;  %v5427_v38 = vmov 0  ;;  %v4149_v8 = vld [vmem:[%s5372_s5 + $0x208] sm:$0xff]   ;;  %v4162_v13 = vld [vmem:[%s5374_s7 + $0x30] sm:$0xff]  }
 0x132   : > { %3689 = vmatpush3.bf16.msra.mxu1 %v4131_v32  ;;  %v5426_v20 = vsel %vm4939_vm13, 4294967295, %v5425_v20  ;;  %vm1109_vm0 = vcmp.ne.s32.totalorder %v971_v21, 15  ;;  %vm1094_vm1 = vcmp.ne.s32.totalorder %v978_v24, 0  ;;  %v888_v32 = vadd.s32 112, %v4631_v55  ;;  %v1240_v55 = vld [vmem:[#allocation2 + $0x79] sm:$0xff] }
 0x133   : > { %872 = vst [vmem:[#allocation2 + $0xa0] sm:$0xff] %v4873_v48  ;;  %3690 = vmatprep.subr.bf16.mxu1 %v4136_v54  ;;  %3753 = vmatpush3.bf16.msra.mxu0 %v4141_v40  ;;  %v1505_v59 = vpack.c.bf16 %v4873_v48, %v4860_v37  ;;  %vm4957_vm8 = vmpackc.low %vm1109_vm0, %vm4278_vm3  ;;  %v4961_v54 = vpack.c.bf16 %v1237_v31, %v1236_v28  ;;  %v985_v41 = vand.u32 15, %v887_v27  ;;  %v4161_v37 = vld [vmem:[%s5374_s7 + $0x28] sm:$0xff]   ;;  %v4163_v28 = vld [vmem:[%s5374_s7 + $0x38] sm:$0xff]  }
 0x134   : > { %3383 = vmatmul.mubr.msk.bf16.gmra.mrb[16].mxu1 %vm4827_vm15, %v4764_v39  ;;  %3754 = vmatprep.subr.bf16.mxu0 %v4144_v44  ;;  %v5428_v38 = vsel %vm4957_vm8, 4294967295, %v5427_v38  ;;  %vm4964_vm9 = vmpackc.low %vm4278_vm3, %vm1094_vm1  ;;  %v4971_v42 = vpack.c.bf16 %v1319_v35, %v1318_v34  ;;  %v992_v43 = vand.u32 15, %v888_v32  ;;  %v1320_v44 = vld [vmem:[#allocation2 + $0x87] sm:$0xff] }
 0x135   : > { %3419 = vmatmul.mubr.msk.bf16.gmra.mrb[32].mxu0 %vm4878_vm2, %v4885_v51  ;;  %2281 = vmatprep.mubr.bf16.mxu1 %v4669_v46  ;;  %vm1111_vm0 = vcmp.ne.s32.totalorder %v985_v41, 15 }
 0x136   : > { %3422 = vmatprep.mubr.msk.bf16.mxu0 %vm4888_vm6, %v4904_v62  ;;  %3691 = vmatpush3.bf16.msra.mxu1 %v4137_v50  ;;  %v1238_v50 = vld [vmem:[#allocation2 + $0x69] sm:$0xff]  ;;  %vm1096_vm1 = vcmp.ne.s32.totalorder %v992_v43, 0 }
 0x137   : > { %3692 = vmatprep.subr.bf16.mxu1 %v4142_v57  ;;  %3755 = vmatpush3.bf16.msra.mxu0 %v4145_v58  ;;  %v4986_v58 = vpack.c.bf16 %v1321_v45, %v1320_v44  ;;  %v4988_v63 = vpack.c.bf16 %v1239_v53, %v1238_v50 }
 0x138   : > { %3756 = vmatprep.subr.bf16.mxu0 %v4146_v0 }
 0x13a   : > { %3693 = vmatpush3.bf16.msra.mxu1 %v4143_v1  ;;  %v999_v1 = vand.u32 15, %v889_v47  ;;  %v1528_v36 = vld [vmem:[#allocation2 + $0x99] sm:$0xff]  ;;  %v1529_v23 = vld [vmem:[#allocation2 + $0xa1] sm:$0xff] }
 0x13b   : > { %3757 = vmatpush3.bf16.msra.mxu0 %v4147_v2  ;;  %3910 = vmatprep.subr.bf16.mxu1 %v4926_v9  ;;  %v1241_v2 = vld [vmem:[#allocation2 + $0x81] sm:$0xff] }
 0x13c   : > { %3386 = vmatmul.mubr.msk.bf16.gmra.mrb[20].mxu1 %vm4888_vm6, %v4815_v7  ;;  %v5010_v4 = vpack.c.bf16 %v1241_v2, %v1240_v55  ;;  %3942 = vmatprep.subr.bf16.mxu0 %v4156_v6 }
 0x13d   : > { %3425 = vmatmul.mubr.msk.bf16.gmra.mrb[36].mxu0 %vm4930_vm12, %v4936_v18  ;;  %2289 = vmatprep.mubr.bf16.mxu1 %v4750_v29 }
 0x13e   : > { %3428 = vmatprep.mubr.msk.bf16.mxu0 %vm4939_vm13, %v4934_v17 }
 0x144   : > { %3389 = vmatmul.mubr.msk.bf16.gmra.mrb[24].mxu1 %vm4939_vm13, %v4904_v62  ;;  %vm4982_vm13 = vmpackc.low %vm1111_vm0, %vm4278_vm3  ;;  %vm1113_vm0 = vcmp.ne.s32.totalorder %v999_v1, 15 }
 0x145   : > { %3431 = vmatmul.mubr.msk.bf16.gmra.mrb[40].mxu0 %vm4957_vm8, %v4961_v54  ;;  %2297 = vmatprep.mubr.bf16.mxu1 %v4738_v25  ;;  %vm4991_vm8 = vmpackc.low %vm4278_vm3, %vm1096_vm1 }
 0x146   : > { %3434 = vmatprep.mubr.msk.bf16.mxu0 %vm4964_vm9, %v4971_v42  ;;  %vm5006_vm1 = vmpackc.low %vm1113_vm0, %vm4278_vm3  ;;  %vm5437_vm3 = vnez %v5428_v38 }
 0x14c   : > { %3392 = vmatmul.mubr.msk.bf16.gmra.mrb[28].mxu1 %vm4964_vm9, %v4934_v17 }
 0x14d   : > { %3437 = vmatmul.mubr.msk.bf16.gmra.mrb[44].mxu0 %vm4982_vm13, %v4988_v63  ;;  %2305 = vmatprep.mubr.bf16.mxu1 %v4820_v10 }
 0x14e   : > { %3440 = vmatprep.mubr.msk.bf16.mxu0 %vm4991_vm8, %v4986_v58 }
 0x154   : > { %3395 = vmatmul.mubr.msk.bf16.gmra.mrb[32].mxu1 %vm4991_vm8, %v4971_v42 }
 0x155   : > { %3443 = vmatmul.mubr.msk.bf16.gmra.mrb[48].mxu0 %vm5006_vm1, %v5010_v4  ;;  %3446 = vmatprep.mubr.msk.bf16.mxu1 %vm4657_vm5, %v4752_v30  ;;  %v4150_v30 = vld [vmem:[%s5372_s5 + $0x210] sm:$0xff]  }
 0x156   : > { %2540 = vmatprep.mubr.bf16.mxu0 %v4642_v19 }
 0x15c   : > { %2444 = vmatmul.mubr.bf16.vlgmr.msra.gmra.mrb[36].mxu1 %v4644_v22  ;;  %v4151_v22 = vld [vmem:[%s5372_s5 + $0x218] sm:$0xff]  }
 0x15d   : > { %3470 = vmatmul.mubr.msk.bf16.vlgmr.msra.gmra.mrb[52].mxu0 %vm4651_vm4, %v4683_v61  ;;  %3911 = vmatpush3.bf16.msra.mxu1 %v4926_v9  ;;  %vm5438_vm4 = vnez %v5426_v20  ;;  %v1401_v61 = vld [vmem:[#allocation2 + $0x91] sm:$0xff] }
 0x15e   : > { %3449 = vmatprep.mubr.msk.bf16.mxu1 %vm4734_vm10, %v4822_v11  ;;  %2548 = vmatprep.mubr.bf16.mxu0 %v4673_v56 }
 0x15f   : > { %3912 = vmatprep.subr.bf16.mxu1 %v4149_v8  ;;  %3943 = vmatpush3.bf16.msra.mxu0 %v4156_v6 }
 0x161   : > { %3913 = vmatpush3.bf16.msra.mxu1 %v4149_v8 }
 0x162   : > { %3914 = vmatprep.subr.bf16.mxu1 %v4150_v30 }
 0x164   : > { %2452 = vmatmul.mubr.bf16.gmra.mrb[40].mxu1 %v4642_v19  ;;  %v4153_v19 = vld [vmem:[%s5372_s5 + $0x228] sm:$0xff]  }
 0x165   : > { %3473 = vmatmul.mubr.msk.bf16.gmra.mrb[56].mxu0 %vm4679_vm7, %v4764_v39  ;;  %3452 = vmatprep.mubr.msk.bf16.mxu1 %vm4811_vm14, %v4885_v51 }
 0x166   : > { %2556 = vmatprep.mubr.bf16.mxu0 %v4669_v46  ;;  %3915 = vmatpush3.bf16.msra.mxu1 %v4150_v30 }
 0x167   : > { %3916 = vmatprep.subr.bf16.mxu1 %v4151_v22 }
 0x16a   : > { %3917 = vmatpush3.bf16.msra.mxu1 %v4151_v22 }
 0x16b   : > { %3918 = vmatprep.subr.bf16.mxu1 %v4152_v33 }
 0x16c   : > { %2460 = vmatmul.mubr.bf16.gmra.mrb[44].mxu1 %v4673_v56  ;;  %v4155_v56 = vld [vmem:[%s5372_s5 + $0x238] sm:$0xff]  }
 0x16d   : > { %3476 = vmatmul.mubr.msk.bf16.gmra.mrb[60].mxu0 %vm4743_vm11, %v4815_v7  ;;  %3455 = vmatprep.mubr.msk.bf16.mxu1 %vm4878_vm2, %v4936_v18  ;;  %v4157_v7 = vld [vmem:[%s5374_s7 + $0x8] sm:$0xff]  }
 0x16e   : > { %2564 = vmatprep.mubr.bf16.mxu0 %v4750_v29  ;;  %3919 = vmatpush3.bf16.msra.mxu1 %v4152_v33 }
 0x16f   : > { %3920 = vmatprep.subr.bf16.mxu1 %v4153_v19  ;;  %3944 = vmatprep.subr.bf16.mxu0 %v4157_v7 }
 0x170   : > { %3945 = vmatpush3.bf16.msra.mxu0 %v4157_v7 }
 0x172   : > { %3921 = vmatpush3.bf16.msra.mxu1 %v4153_v19 }
 0x173   : > { %3922 = vmatprep.subr.bf16.mxu1 %v4154_v60 }
 0x174   : > { %2468 = vmatmul.mubr.bf16.gmra.mrb[48].mxu1 %v4669_v46  ;;  %v1400_v46 = vld [vmem:[#allocation2 + $0x89] sm:$0xff] }
 0x175   : > { %3479 = vmatmul.mubr.msk.bf16.gmra.mrb[64].mxu0 %vm4827_vm15, %v4904_v62  ;;  %3458 = vmatprep.mubr.msk.bf16.mxu1 %vm4930_vm12, %v4961_v54  ;;  %v3466_v26 = vpack.c.bf16 %v1401_v61, %v1400_v46 }
 0x176   : > { %2572 = vmatprep.mubr.bf16.mxu0 %v4738_v25  ;;  %3923 = vmatpush3.bf16.msra.mxu1 %v4154_v60 }
 0x177   : > { %3924 = vmatprep.subr.bf16.mxu1 %v4155_v56 }
 0x17a   : > { %3925 = vmatpush3.bf16.msra.mxu1 %v4155_v56 }
 0x17b   : > { %3974 = vmatprep.subr.bf16.mxu1 %v4156_v6 }
 0x17c   : > { %2476 = vmatmul.mubr.bf16.gmra.mrb[52].mxu1 %v4750_v29  ;;  %v1449_v29 = vld [vmem:[#allocation2 + $0x9f] sm:$0xff] }
 0x17d   : > { %3482 = vmatmul.mubr.msk.bf16.gmra.mrb[68].mxu0 %vm4888_vm6, %v4934_v17  ;;  %3461 = vmatprep.mubr.msk.bf16.mxu1 %vm5437_vm3, %v4988_v63 }
 0x17e   : > { %2580 = vmatprep.mubr.bf16.mxu0 %v4820_v10 }
 0x184   : > { %2484 = vmatmul.mubr.bf16.gmra.mrb[56].mxu1 %v4738_v25  ;;  %v1448_v25 = vld [vmem:[#allocation2 + $0x97] sm:$0xff] }
 0x185   : > { %3485 = vmatmul.mubr.msk.bf16.gmra.mrb[72].mxu0 %vm5438_vm4, %v4971_v42  ;;  %3464 = vmatprep.mubr.msk.bf16.mxu1 %vm4982_vm13, %v5010_v4  ;;  %v3490_v39 = vpack.c.bf16 %v1449_v29, %v1448_v25 }
 0x186   : > { %2588 = vmatprep.mubr.bf16.mxu0 %v4806_v5 }
 0x18c   : > { %2492 = vmatmul.mubr.bf16.gmra.mrb[60].mxu1 %v4820_v10  ;;  %v4158_v10 = vld [vmem:[%s5374_s7 + $0x10] sm:$0xff]  }
 0x18d   : > { %3488 = vmatmul.mubr.msk.bf16.gmra.mrb[76].mxu0 %vm4964_vm9, %v4986_v58  ;;  %3467 = vmatprep.mubr.msk.bf16.mxu1 %vm5006_vm1, %v3466_v26 }
 0x18e   : > { %2596 = vmatprep.mubr.bf16.mxu0 %v1505_v59  ;;  %3946 = vmatprep.subr.bf16.mxu0 %v4158_v10 }
 0x18f   : > { %3947 = vmatpush3.bf16.msra.mxu0 %v4158_v10 }
 0x194   : > { %2500 = vmatmul.mubr.bf16.gmra.mrb[64].mxu1 %v4806_v5  ;;  %v3514_v5 = vpack.c.bf16 %v1529_v23, %v1528_v36 }
 0x195   : > { %3491 = vmatmul.mubr.msk.bf16.gmra.mrb[80].mxu0 %vm4991_vm8, %v3490_v39  ;;  %3926 = vmatprep.mubr.msk.bf16.mxu1 %vm4657_vm5, %v4822_v11  ;;  %v4159_v11 = vld [vmem:[%s5374_s7 + $0x18] sm:$0xff]  }
 0x196   : > { %3948 = vmatprep.subr.bf16.mxu0 %v4159_v11 }
 0x197   : > { %3949 = vmatpush3.bf16.msra.mxu0 %v4159_v11 }
 0x198   : > { %3950 = vmatprep.subr.bf16.mxu0 %v4160_v12 }
 0x19b   : > { %3951 = vmatpush3.bf16.msra.mxu0 %v4160_v12 }
 0x19c   : > { %3927 = vmatmul.mubr.msk.bf16.vlgmr.msra.gmra.mrb[68].mxu1 %vm4734_vm10, %v4885_v51  ;;  %3952 = vmatprep.subr.bf16.mxu0 %v4161_v37  ;;  %v5147_v51 = vld [vmem:[%s5373_s6] ss:$0 sm:$0xff] }
 0x19d   : > { %3930 = vmatprep.mubr.msk.bf16.mxu1 %vm4811_vm14, %v4936_v18  ;;  %3982 = vmatpush3.bf16.msra.mxu1 %v4156_v6 }
 0x19e   : > { %3975 = vmatprep.subr.bf16.mxu1 %v4157_v7 }
 0x19f   : > { %3953 = vmatpush3.bf16.msra.mxu0 %v4161_v37 }
 0x1a0   : > { %3954 = vmatprep.subr.bf16.mxu0 %v4162_v13 }
 0x1a1   : > { %3983 = vmatpush3.bf16.msra.mxu1 %v4157_v7 }
 0x1a2   : > { %3976 = vmatprep.subr.bf16.mxu1 %v4158_v10 }
 0x1a3   : > { %3955 = vmatpush3.bf16.msra.mxu0 %v4162_v13 }
 0x1a4   : > { %3931 = vmatmul.mubr.msk.bf16.gmra.mrb[72].mxu1 %vm4878_vm2, %v4961_v54  ;;  %3956 = vmatprep.subr.bf16.mxu0 %v4163_v28 }
 0x1a5   : > { %3934 = vmatprep.mubr.msk.bf16.mxu1 %vm4930_vm12, %v4988_v63  ;;  %3984 = vmatpush3.bf16.msra.mxu1 %v4158_v10 }
 0x1a6   : > { %3977 = vmatprep.subr.bf16.mxu1 %v4159_v11 }
 0x1a7   : > { %3957 = vmatpush3.bf16.msra.mxu0 %v4163_v28 }
 0x1a9   : > { %3985 = vmatpush3.bf16.msra.mxu1 %v4159_v11 }
 0x1aa   : > { %3978 = vmatprep.subr.bf16.mxu1 %v4160_v12 }
 0x1ac   : > { %3935 = vmatmul.mubr.msk.bf16.gmra.mrb[76].mxu1 %vm5437_vm3, %v5010_v4 }
 0x1ad   : > { %3938 = vmatprep.mubr.msk.bf16.mxu1 %vm4982_vm13, %v3466_v26  ;;  %3986 = vmatpush3.bf16.msra.mxu1 %v4160_v12 }
 0x1ae   : > { %3979 = vmatprep.subr.bf16.mxu1 %v4161_v37 }
 0x1b1   : > { %3987 = vmatpush3.bf16.msra.mxu1 %v4161_v37 }
 0x1b2   : > { %3980 = vmatprep.subr.bf16.mxu1 %v4162_v13 }
 0x1b4   : > { %3939 = vmatmul.mubr.msk.bf16.gmra.mrb[80].mxu1 %vm5006_vm1, %v3514_v5 }
 0x1b5   : > { %3988 = vmatpush3.bf16.msra.mxu1 %v4162_v13 }
 0x1b6   : > { %3981 = vmatprep.subr.bf16.mxu1 %v4163_v28 }
 0x1b9   : > { %3989 = vmatpush3.bf16.msra.mxu1 %v4163_v28 }
 0x1ef   : > { %v3566_v48 = vpop.f32.mrb[4].mxu1 }
 0x1f0   : > { %v3630_v49 = vpop.f32.mrb[20].mxu0  ;;  %v3567_v52 = vpop.f32.mrb[5].mxu1 }
 0x1f1   : > { %v3568_v59 = vadd.f32 %v3567_v52, %v3566_v48  ;;  %v3631_v62 = vpop.f32.mrb[21].mxu0  ;;  %v3569_v9 = vpop.f32.mrb[6].mxu1 }
 0x1f2   : > { %v3632_v14 = vadd.f32 %v3631_v62, %v3630_v49  ;;  %v3633_v15 = vpop.f32.mrb[22].mxu0  ;;  %v3570_v16 = vpop.f32.mrb[7].mxu1 }
 0x1f3   : > { %v2252_v17 = vadd.f32 %v3568_v59, %v5147_v51  ;;  %v3571_v18 = vadd.f32 %v3570_v16, %v3569_v9  ;;  %v3634_v20 = vpop.f32.mrb[23].mxu0 }
 0x1f4   : > { %v3635_v21 = vadd.f32 %v3634_v20, %v3633_v15 }
 0x1f5   : > { %v5153_v24 = vadd.f32 %v3632_v14, %v2252_v17  ;;  %v2255_v27 = vadd.f32 %v3571_v18, %v5147_v51 }
 0x1f7   : > { %v5159_v31 = vadd.f32 %v3635_v21, %v2255_v27  ;;  %v3572_v32 = vpop.f32.mrb[8].mxu1 }
 0x1f8   : > { %v3636_v34 = vpop.f32.mrb[24].mxu0  ;;  %v3573_v35 = vpop.f32.mrb[9].mxu1 }
 0x1f9   : > { %v3574_v38 = vadd.f32 %v3573_v35, %v3572_v32  ;;  %v3637_v54 = vpop.f32.mrb[25].mxu0  ;;  %v3575_v40 = vpop.f32.mrb[10].mxu1 }
 0x1fa   : > { %v3638_v41 = vadd.f32 %v3637_v54, %v3636_v34  ;;  %v3639_v42 = vpop.f32.mrb[26].mxu0  ;;  %v3576_v43 = vpop.f32.mrb[11].mxu1 }
 0x1fb   : > { %v2260_v44 = vadd.f32 %v3574_v38, %v5147_v51  ;;  %v3577_v45 = vadd.f32 %v3576_v43, %v3575_v40  ;;  %v3640_v47 = vpop.f32.mrb[27].mxu0 }
 0x1fc   : > { %v3641_v50 = vadd.f32 %v3640_v47, %v3639_v42 }
 0x1fd   : > { %v5162_v53 = vadd.f32 %v3638_v41, %v2260_v44  ;;  %v2263_v57 = vadd.f32 %v3577_v45, %v5147_v51 }
 0x1ff   : > { %v5165_v58 = vadd.f32 %v3641_v50, %v2263_v57  ;;  %v3578_v63 = vpop.f32.mrb[12].mxu1 }
 0x200   : > { %v3642_v0 = vpop.f32.mrb[28].mxu0  ;;  %v3579_v1 = vpop.f32.mrb[13].mxu1 }
 0x201   : > { %v3580_v55 = vadd.f32 %v3579_v1, %v3578_v63  ;;  %v3643_v2 = vpop.f32.mrb[29].mxu0  ;;  %v3581_v3 = vpop.f32.mrb[14].mxu1 }
 0x202   : > { %v3644_v4 = vadd.f32 %v3643_v2, %v3642_v0  ;;  %v3645_v8 = vpop.f32.mrb[30].mxu0  ;;  %v3582_v30 = vpop.f32.mrb[15].mxu1 }
 0x203   : > { %v2268_v22 = vadd.f32 %v3580_v55, %v5147_v51  ;;  %v3583_v33 = vadd.f32 %v3582_v30, %v3581_v3  ;;  %v3646_v19 = vpop.f32.mrb[31].mxu0 }
 0x204   : > { %v3647_v60 = vadd.f32 %v3646_v19, %v3645_v8 }
 0x205   : > { %v5168_v56 = vadd.f32 %v3644_v4, %v2268_v22  ;;  %v2271_v46 = vadd.f32 %v3583_v33, %v5147_v51 }
 0x207   : > { %v5171_v61 = vadd.f32 %v3647_v60, %v2271_v46  ;;  %v3584_v26 = vpop.f32.mrb[16].mxu1 }
 0x208   : > { %v3648_v25 = vpop.f32.mrb[32].mxu0  ;;  %v3585_v29 = vpop.f32.mrb[17].mxu1 }
 0x209   : > { %v3586_v39 = vadd.f32 %v3585_v29, %v3584_v26  ;;  %v3649_v36 = vpop.f32.mrb[33].mxu0  ;;  %v3587_v23 = vpop.f32.mrb[18].mxu1 }
 0x20a   : > { %v3650_v5 = vadd.f32 %v3649_v36, %v3648_v25  ;;  %v3651_v6 = vpop.f32.mrb[34].mxu0  ;;  %v3588_v7 = vpop.f32.mrb[19].mxu1 }
 0x20b   : > { %v2276_v10 = vadd.f32 %v3586_v39, %v5147_v51  ;;  %v3589_v11 = vadd.f32 %v3588_v7, %v3587_v23  ;;  %v3652_v12 = vpop.f32.mrb[35].mxu0 }
 0x20c   : > { %v3653_v37 = vadd.f32 %v3652_v12, %v3651_v6 }
 0x20d   : > { %v5174_v48 = vadd.f32 %v3650_v5, %v2276_v10  ;;  %v2279_v49 = vadd.f32 %v3589_v11, %v5147_v51 }
 0x20f   : > { %v5177_v52 = vadd.f32 %v3653_v37, %v2279_v49  ;;  %v3590_v59 = vpop.f32.mrb[20].mxu1 }
 0x210   : > { %v3654_v62 = vpop.f32.mrb[36].mxu0  ;;  %v3591_v9 = vpop.f32.mrb[21].mxu1 }
 0x211   : > { %v3592_v13 = vadd.f32 %v3591_v9, %v3590_v59  ;;  %v3655_v14 = vpop.f32.mrb[37].mxu0  ;;  %v3593_v15 = vpop.f32.mrb[22].mxu1 }
 0x212   : > { %v3656_v16 = vadd.f32 %v3655_v14, %v3654_v62  ;;  %v3657_v17 = vpop.f32.mrb[38].mxu0  ;;  %v3594_v18 = vpop.f32.mrb[23].mxu1 }
 0x213   : > { %v2284_v20 = vadd.f32 %v3592_v13, %v5147_v51  ;;  %v3595_v21 = vadd.f32 %v3594_v18, %v3593_v15  ;;  %v3658_v27 = vpop.f32.mrb[39].mxu0 }
 0x214   : > { %v3659_v28 = vadd.f32 %v3658_v27, %v3657_v17 }
 0x215   : > { %v5180_v32 = vadd.f32 %v3656_v16, %v2284_v20  ;;  %v2287_v34 = vadd.f32 %v3595_v21, %v5147_v51 }
 0x217   : > { %v5183_v35 = vadd.f32 %v3659_v28, %v2287_v34  ;;  %v3596_v38 = vpop.f32.mrb[24].mxu1 }
 0x218   : > { %v3660_v54 = vpop.f32.mrb[40].mxu0  ;;  %v3597_v40 = vpop.f32.mrb[25].mxu1 }
 0x219   : > { %v3598_v41 = vadd.f32 %v3597_v40, %v3596_v38  ;;  %v3661_v42 = vpop.f32.mrb[41].mxu0  ;;  %v3599_v43 = vpop.f32.mrb[26].mxu1 }
 0x21a   : > { %v3662_v44 = vadd.f32 %v3661_v42, %v3660_v54  ;;  %v3663_v45 = vpop.f32.mrb[42].mxu0  ;;  %v3600_v47 = vpop.f32.mrb[27].mxu1 }
 0x21b   : > { %v2292_v50 = vadd.f32 %v3598_v41, %v5147_v51  ;;  %v3601_v57 = vadd.f32 %v3600_v47, %v3599_v43  ;;  %v3664_v63 = vpop.f32.mrb[43].mxu0 }
 0x21c   : > { %v3665_v0 = vadd.f32 %v3664_v63, %v3663_v45 }
 0x21d   : > { %v5186_v1 = vadd.f32 %v3662_v44, %v2292_v50  ;;  %v2295_v55 = vadd.f32 %v3601_v57, %v5147_v51 }
 0x21f   : > { %v5189_v2 = vadd.f32 %v3665_v0, %v2295_v55  ;;  %v3602_v3 = vpop.f32.mrb[28].mxu1 }
 0x220   : > { %v3666_v4 = vpop.f32.mrb[44].mxu0  ;;  %v3603_v8 = vpop.f32.mrb[29].mxu1 }
 0x221   : > { %v3604_v30 = vadd.f32 %v3603_v8, %v3602_v3  ;;  %v3667_v22 = vpop.f32.mrb[45].mxu0  ;;  %v3605_v33 = vpop.f32.mrb[30].mxu1 }
 0x222   : > { %v3668_v19 = vadd.f32 %v3667_v22, %v3666_v4  ;;  %v3669_v60 = vpop.f32.mrb[46].mxu0  ;;  %v3606_v46 = vpop.f32.mrb[31].mxu1 }
 0x223   : > { %v2300_v26 = vadd.f32 %v3604_v30, %v5147_v51  ;;  %v3607_v25 = vadd.f32 %v3606_v46, %v3605_v33  ;;  %v3670_v29 = vpop.f32.mrb[47].mxu0 }
 0x224   : > { %v3671_v39 = vadd.f32 %v3670_v29, %v3669_v60 }
 0x225   : > { %v5192_v36 = vadd.f32 %v3668_v19, %v2300_v26  ;;  %v2303_v23 = vadd.f32 %v3607_v25, %v5147_v51 }
 0x227   : > { %v5195_v5 = vadd.f32 %v3671_v39, %v2303_v23  ;;  %v3608_v6 = vpop.f32.mrb[32].mxu1 }
 0x228   : > { %v3672_v7 = vpop.f32.mrb[48].mxu0  ;;  %v3609_v10 = vpop.f32.mrb[33].mxu1 }
 0x229   : > { %v3610_v11 = vadd.f32 %v3609_v10, %v3608_v6  ;;  %v3673_v12 = vpop.f32.mrb[49].mxu0  ;;  %v3611_v37 = vpop.f32.mrb[34].mxu1 }
 0x22a   : > { %v3674_v49 = vadd.f32 %v3673_v12, %v3672_v7  ;;  %v3675_v59 = vpop.f32.mrb[50].mxu0  ;;  %v3612_v62 = vpop.f32.mrb[35].mxu1 }
 0x22b   : > { %v2308_v9 = vadd.f32 %v3610_v11, %v5147_v51  ;;  %v3613_v13 = vadd.f32 %v3612_v62, %v3611_v37  ;;  %v3676_v14 = vpop.f32.mrb[51].mxu0 }
 0x22c   : > { %v3677_v15 = vadd.f32 %v3676_v14, %v3675_v59 }
 0x22d   : > { %v5198_v16 = vadd.f32 %v3674_v49, %v2308_v9  ;;  %v2311_v17 = vadd.f32 %v3613_v13, %v5147_v51 }
 0x22f   : > { %v5201_v18 = vadd.f32 %v3677_v15, %v2311_v17  ;;  %v3694_v20 = vpop.f32.mrb[36].mxu1 }
 0x230   : > { %v3758_v21 = vpop.f32.mrb[52].mxu0  ;;  %v3695_v27 = vpop.f32.mrb[37].mxu1 }
 0x231   : > { %v3696_v28 = vadd.f32 %v3695_v27, %v3694_v20  ;;  %v3759_v34 = vpop.f32.mrb[53].mxu0  ;;  %v3697_v38 = vpop.f32.mrb[38].mxu1 }
 0x232   : > { %v3760_v54 = vadd.f32 %v3759_v34, %v3758_v21  ;;  %v3761_v40 = vpop.f32.mrb[54].mxu0  ;;  %v3698_v41 = vpop.f32.mrb[39].mxu1 }
 0x233   : > { %v2446_v42 = vadd.f32 %v3696_v28, %v5153_v24  ;;  %v3699_v43 = vadd.f32 %v3698_v41, %v3697_v38  ;;  %v3762_v44 = vpop.f32.mrb[55].mxu0 }
 0x234   : > { %v3763_v45 = vadd.f32 %v3762_v44, %v3761_v40 }
 0x235   : > { %v2449_v47 = vadd.f32 %v3699_v43, %v5159_v31  ;;  %v5205_v50 = vadd.f32 %v3760_v54, %v2446_v42 }
 0x237   : > { %v3700_v51 = vpop.f32.mrb[40].mxu1  ;;  %v5207_v57 = vadd.f32 %v3763_v45, %v2449_v47 }
 0x238   : > { %v3764_v63 = vpop.f32.mrb[56].mxu0  ;;  %v3701_v0 = vpop.f32.mrb[41].mxu1 }
 0x239   : > { %v3702_v55 = vadd.f32 %v3701_v0, %v3700_v51  ;;  %v3765_v3 = vpop.f32.mrb[57].mxu0  ;;  %v3703_v4 = vpop.f32.mrb[42].mxu1 }
 0x23a   : > { %v3766_v8 = vadd.f32 %v3765_v3, %v3764_v63  ;;  %v3767_v30 = vpop.f32.mrb[58].mxu0  ;;  %v3704_v22 = vpop.f32.mrb[43].mxu1 }
 0x23b   : > { %v2454_v24 = vadd.f32 %v3702_v55, %v5162_v53  ;;  %v3705_v33 = vadd.f32 %v3704_v22, %v3703_v4  ;;  %v3768_v19 = vpop.f32.mrb[59].mxu0 }
 0x23c   : > { %v3769_v60 = vadd.f32 %v3768_v19, %v3767_v30 }
 0x23d   : > { %v2457_v31 = vadd.f32 %v3705_v33, %v5165_v58  ;;  %v5211_v46 = vadd.f32 %v3766_v8, %v2454_v24 }
 0x23f   : > { %v3706_v26 = vpop.f32.mrb[44].mxu1  ;;  %v5213_v25 = vadd.f32 %v3769_v60, %v2457_v31 }
 0x240   : > { %v3770_v29 = vpop.f32.mrb[60].mxu0  ;;  %v3707_v39 = vpop.f32.mrb[45].mxu1 }
 0x241   : > { %v3708_v23 = vadd.f32 %v3707_v39, %v3706_v26  ;;  %v3771_v6 = vpop.f32.mrb[61].mxu0  ;;  %v3709_v7 = vpop.f32.mrb[46].mxu1 }
 0x242   : > { %v3772_v10 = vadd.f32 %v3771_v6, %v3770_v29  ;;  %v3773_v11 = vpop.f32.mrb[62].mxu0  ;;  %v3710_v12 = vpop.f32.mrb[47].mxu1 }
 0x243   : > { %v2462_v53 = vadd.f32 %v3708_v23, %v5168_v56  ;;  %v3711_v37 = vadd.f32 %v3710_v12, %v3709_v7  ;;  %v3774_v49 = vpop.f32.mrb[63].mxu0 }
 0x244   : > { %v3775_v59 = vadd.f32 %v3774_v49, %v3773_v11 }
 0x245   : > { %v2465_v58 = vadd.f32 %v3711_v37, %v5171_v61  ;;  %v5217_v62 = vadd.f32 %v3772_v10, %v2462_v53 }
 0x247   : > { %v3712_v9 = vpop.f32.mrb[48].mxu1  ;;  %v5219_v13 = vadd.f32 %v3775_v59, %v2465_v58 }
 0x248   : > { %v3776_v14 = vpop.f32.mrb[64].mxu0  ;;  %v3713_v15 = vpop.f32.mrb[49].mxu1 }
 0x249   : > { %v3714_v17 = vadd.f32 %v3713_v15, %v3712_v9  ;;  %v3777_v20 = vpop.f32.mrb[65].mxu0  ;;  %v3715_v21 = vpop.f32.mrb[50].mxu1 }
 0x24a   : > { %v3778_v27 = vadd.f32 %v3777_v20, %v3776_v14  ;;  %v3779_v28 = vpop.f32.mrb[66].mxu0  ;;  %v3716_v34 = vpop.f32.mrb[51].mxu1 }
 0x24b   : > { %v2470_v56 = vadd.f32 %v3714_v17, %v5174_v48  ;;  %v3717_v38 = vadd.f32 %v3716_v34, %v3715_v21  ;;  %v3780_v54 = vpop.f32.mrb[67].mxu0 }
 0x24c   : > { %v3781_v40 = vadd.f32 %v3780_v54, %v3779_v28 }
 0x24d   : > { %v2473_v61 = vadd.f32 %v3717_v38, %v5177_v52  ;;  %v5223_v41 = vadd.f32 %v3778_v27, %v2470_v56 }
 0x24f   : > { %v3718_v42 = vpop.f32.mrb[52].mxu1  ;;  %v5225_v43 = vadd.f32 %v3781_v40, %v2473_v61 }
 0x250   : > { %v3782_v44 = vpop.f32.mrb[68].mxu0  ;;  %v3719_v45 = vpop.f32.mrb[53].mxu1 }
 0x251   : > { %v3720_v47 = vadd.f32 %v3719_v45, %v3718_v42  ;;  %v3783_v51 = vpop.f32.mrb[69].mxu0  ;;  %v3721_v63 = vpop.f32.mrb[54].mxu1 }
 0x252   : > { %v3784_v0 = vadd.f32 %v3783_v51, %v3782_v44  ;;  %v3785_v55 = vpop.f32.mrb[70].mxu0  ;;  %v3722_v3 = vpop.f32.mrb[55].mxu1 }
 0x253   : > { %v2478_v48 = vadd.f32 %v3720_v47, %v5180_v32  ;;  %v3723_v4 = vadd.f32 %v3722_v3, %v3721_v63  ;;  %v3786_v8 = vpop.f32.mrb[71].mxu0 }
 0x254   : > { %v3787_v30 = vadd.f32 %v3786_v8, %v3785_v55 }
 0x255   : > { %v2481_v52 = vadd.f32 %v3723_v4, %v5183_v35  ;;  %v5229_v22 = vadd.f32 %v3784_v0, %v2478_v48 }
 0x257   : > { %v3724_v24 = vpop.f32.mrb[56].mxu1  ;;  %v5231_v33 = vadd.f32 %v3787_v30, %v2481_v52 }
 0x258   : > { %v3788_v19 = vpop.f32.mrb[72].mxu0  ;;  %v3725_v60 = vpop.f32.mrb[57].mxu1 }
 0x259   : > { %v3726_v31 = vadd.f32 %v3725_v60, %v3724_v24  ;;  %v3789_v26 = vpop.f32.mrb[73].mxu0  ;;  %v3727_v29 = vpop.f32.mrb[58].mxu1 }
 0x25a   : > { %v3790_v39 = vadd.f32 %v3789_v26, %v3788_v19  ;;  %v3791_v23 = vpop.f32.mrb[74].mxu0  ;;  %v3728_v6 = vpop.f32.mrb[59].mxu1 }
 0x25b   : > { %v2486_v32 = vadd.f32 %v3726_v31, %v5186_v1  ;;  %v3729_v7 = vadd.f32 %v3728_v6, %v3727_v29  ;;  %v3792_v10 = vpop.f32.mrb[75].mxu0 }
 0x25c   : > { %v3793_v11 = vadd.f32 %v3792_v10, %v3791_v23 }
 0x25d   : > { %v2489_v35 = vadd.f32 %v3729_v7, %v5189_v2  ;;  %v5235_v12 = vadd.f32 %v3790_v39, %v2486_v32 }
 0x25f   : > { %v3730_v53 = vpop.f32.mrb[60].mxu1  ;;  %v5237_v37 = vadd.f32 %v3793_v11, %v2489_v35 }
 0x260   : > { %v3794_v49 = vpop.f32.mrb[76].mxu0  ;;  %v3731_v59 = vpop.f32.mrb[61].mxu1 }
 0x261   : > { %v3732_v58 = vadd.f32 %v3731_v59, %v3730_v53  ;;  %v3795_v9 = vpop.f32.mrb[77].mxu0  ;;  %v3733_v14 = vpop.f32.mrb[62].mxu1 }
 0x262   : > { %v3796_v15 = vadd.f32 %v3795_v9, %v3794_v49  ;;  %v3797_v17 = vpop.f32.mrb[78].mxu0  ;;  %v3734_v20 = vpop.f32.mrb[63].mxu1 }
 0x263   : > { %v2494_v1 = vadd.f32 %v3732_v58, %v5192_v36  ;;  %v3735_v21 = vadd.f32 %v3734_v20, %v3733_v14  ;;  %v3798_v27 = vpop.f32.mrb[79].mxu0 }
 0x264   : > { %v3799_v28 = vadd.f32 %v3798_v27, %v3797_v17 }
 0x265   : > { %v2497_v2 = vadd.f32 %v3735_v21, %v5195_v5  ;;  %v5241_v34 = vadd.f32 %v3796_v15, %v2494_v1 }
 0x267   : > { %v3736_v56 = vpop.f32.mrb[64].mxu1  ;;  %v5243_v38 = vadd.f32 %v3799_v28, %v2497_v2 }
 0x268   : > { %v3800_v54 = vpop.f32.mrb[80].mxu0  ;;  %v3737_v40 = vpop.f32.mrb[65].mxu1 }
 0x269   : > { %v3738_v61 = vadd.f32 %v3737_v40, %v3736_v56  ;;  %v3801_v42 = vpop.f32.mrb[81].mxu0  ;;  %v3739_v44 = vpop.f32.mrb[66].mxu1 }
 0x26a   : > { %v3802_v45 = vadd.f32 %v3801_v42, %v3800_v54  ;;  %v3803_v47 = vpop.f32.mrb[82].mxu0  ;;  %v3740_v51 = vpop.f32.mrb[67].mxu1 }
 0x26b   : > { %v2502_v36 = vadd.f32 %v3738_v61, %v5198_v16  ;;  %v3741_v63 = vadd.f32 %v3740_v51, %v3739_v44  ;;  %v3804_v0 = vpop.f32.mrb[83].mxu0 }
 0x26c   : > { %v3805_v55 = vadd.f32 %v3804_v0, %v3803_v47 }
 0x26d   : > { %v2505_v5 = vadd.f32 %v3741_v63, %v5201_v18  ;;  %v2599_v3 = vadd.f32 %v3802_v45, %v2502_v36  ;;  %v4172_v63 = vld [vmem:[%s4450_s27 + $0x8] sm:$0xff]  }
 0x26e   : > { %v2896_v0 = vunpack.c.l.bf16 %v4172_v63 }
 0x26f   : > { %v3928_v48 = vpop.f32.mrb[68].mxu1  ;;  %v2602_v4 = vadd.f32 %v3805_v55, %v2505_v5  ;;  %v4173_v55 = vld [vmem:[%s4450_s27] sm:$0xff]  }
 0x270   : > { %v2648_v8 = vadd.f32 %v3928_v48, %v5211_v46  ;;  %v2639_v30 = vpop.f32.mrb[69].mxu1  ;;  %v2894_v5 = vunpack.c.l.bf16 %v4173_v55 }
 0x271   : > { %v2640_v52 = vadd.f32 %v2639_v30, %v5205_v50  ;;  %v3929_v24 = vpop.f32.mrb[70].mxu1 }
 0x272   : > { %v2651_v19 = vadd.f32 %v3929_v24, %v5213_v25  ;;  %v2642_v60 = vpop.f32.mrb[71].mxu1  ;;  %v2704_v16 = vmax.f32 %v2648_v8, 0.0  ;;  %v2895_v8 = vunpack.c.h.bf16 %v4173_v55 }
 0x273   : > { %v2643_v31 = vadd.f32 %v2642_v60, %v5207_v57  ;;  %v2702_v29 = vmax.f32 %v2640_v52, 0.0 }
 0x274   : > { %v2705_v26 = vmax.f32 %v2651_v19, 0.0 }
 0x275   : > { %v2703_v39 = vmax.f32 %v2643_v31, 0.0 }
 0x276   : > { %v2719_v23 = vpack.c.bf16 %v2705_v26, %v2704_v16 }
 0x277   : > { %v2718_v18 = vpack.c.bf16 %v2703_v39, %v2702_v29  ;;  %v3932_v6 = vpop.f32.mrb[72].mxu1 }
 0x278   : > { %v2664_v32 = vadd.f32 %v3932_v6, %v5223_v41  ;;  %v2655_v7 = vpop.f32.mrb[73].mxu1 }
 0x279   : > { %v2656_v46 = vadd.f32 %v2655_v7, %v5217_v62  ;;  %v3933_v10 = vpop.f32.mrb[74].mxu1  ;;  %3958 = vmatprep.mubr.bf16.mxu0 %v2718_v18  ;;  %v4174_v18 = vld [vmem:[%s4450_s27 + $0x18] sm:$0xff]  }
 0x27a   : > { %v2667_v50 = vadd.f32 %v3933_v10, %v5225_v43  ;;  %v2658_v25 = vpop.f32.mrb[75].mxu1  ;;  %3959 = vmatmul.mubr.bf16.vlgmr.msra.gmra.mrb[84].mxu0 %v2719_v23  ;;  %v2708_v11 = vmax.f32 %v2664_v32, 0.0  ;;  %v2900_v6 = vunpack.c.l.bf16 %v4174_v18  ;;  %v4175_v10 = vld [vmem:[%s4450_s27 + $0x10] sm:$0xff]  }
 0x27b   : > { %v2659_v57 = vadd.f32 %v2658_v25, %v5219_v13  ;;  %v2706_v53 = vmax.f32 %v2656_v46, 0.0 }
 0x27c   : > { %v2709_v35 = vmax.f32 %v2667_v50, 0.0  ;;  %v2898_v50 = vunpack.c.l.bf16 %v4175_v10 }
 0x27d   : > { %v2707_v49 = vmax.f32 %v2659_v57, 0.0 }
 0x27e   : > { %v2721_v59 = vpack.c.bf16 %v2709_v35, %v2708_v11  ;;  %v2901_v35 = vunpack.c.h.bf16 %v4174_v18 }
 0x27f   : > { %v2720_v58 = vpack.c.bf16 %v2707_v49, %v2706_v53  ;;  %v3936_v9 = vpop.f32.mrb[76].mxu1 }
 0x280   : > { %v2680_v41 = vadd.f32 %v3936_v9, %v5235_v12  ;;  %v2671_v14 = vpop.f32.mrb[77].mxu1 }
 0x281   : > { %v2672_v62 = vadd.f32 %v2671_v14, %v5229_v22  ;;  %v3937_v15 = vpop.f32.mrb[78].mxu1  ;;  %3962 = vmatprep.mubr.bf16.mxu0 %v2720_v58  ;;  %v2899_v58 = vunpack.c.h.bf16 %v4175_v10 }
 0x282   : > { %v2683_v43 = vadd.f32 %v3937_v15, %v5237_v37  ;;  %v2674_v17 = vpop.f32.mrb[79].mxu1  ;;  %3963 = vmatmul.mubr.bf16.gmra.mrb[88].mxu0 %v2721_v59  ;;  %v2712_v20 = vmax.f32 %v2680_v41, 0.0 }
 0x283   : > { %v2675_v13 = vadd.f32 %v2674_v17, %v5231_v33  ;;  %v2710_v21 = vmax.f32 %v2672_v62, 0.0 }
 0x284   : > { %v2713_v1 = vmax.f32 %v2683_v43, 0.0 }
 0x285   : > { %v2711_v27 = vmax.f32 %v2675_v13, 0.0 }
 0x286   : > { %v2723_v28 = vpack.c.bf16 %v2713_v1, %v2712_v20  ;;  %v4176_v1 = vld [vmem:[%s4450_s27 + $0x28] sm:$0xff]  }
 0x287   : > { %v2722_v2 = vpack.c.bf16 %v2711_v27, %v2710_v21  ;;  %v3940_v56 = vpop.f32.mrb[80].mxu1  ;;  %v2904_v21 = vunpack.c.l.bf16 %v4176_v1 }
 0x288   : > { %v2696_v54 = vadd.f32 %v3940_v56, %v2599_v3  ;;  %v2687_v12 = vpop.f32.mrb[81].mxu1  ;;  %v4177_v56 = vld [vmem:[%s4450_s27 + $0x20] sm:$0xff]  }
 0x289   : > { %v2688_v40 = vadd.f32 %v2687_v12, %v5241_v34  ;;  %v3941_v22 = vpop.f32.mrb[82].mxu1  ;;  %3966 = vmatprep.mubr.bf16.mxu1 %v2722_v2  ;;  %v5264_v34 = vld [vmem:[%s5375_s8] ss:$0 sm:$0xff] }
 0x28a   : > { %v2699_v37 = vadd.f32 %v3941_v22, %v2602_v4  ;;  %v2690_v61 = vpop.f32.mrb[83].mxu1  ;;  %3967 = vmatmul.mubr.bf16.vlgmr.msra.gmra.mrb[84].mxu1 %v2723_v28  ;;  %v2716_v42 = vmax.f32 %v2696_v54, 0.0  ;;  %v2897_v4 = vunpack.c.h.bf16 %v4172_v63  ;;  %v2902_v54 = vunpack.c.l.bf16 %v4177_v56 }
 0x28b   : > { %v2691_v33 = vadd.f32 %v2690_v61, %v5243_v38  ;;  %v2714_v45 = vmax.f32 %v2688_v40, 0.0 }
 0x28c   : > { %v2717_v44 = vmax.f32 %v2699_v37, 0.0  ;;  %v2905_v37 = vunpack.c.h.bf16 %v4176_v1 }
 0x28d   : > { %v2715_v47 = vmax.f32 %v2691_v33, 0.0 }
 0x28e   : > { %v2725_v51 = vpack.c.bf16 %v2717_v44, %v2716_v42  ;;  %v2903_v44 = vunpack.c.h.bf16 %v4177_v56 }
 0x28f   : > { %v2724_v36 = vpack.c.bf16 %v2715_v47, %v2714_v45 }
 0x291   : > { %3970 = vmatprep.mubr.bf16.mxu1 %v2724_v36 }
 0x292   : > { %3971 = vmatmul.mubr.bf16.gmra.mrb[88].mxu1 %v2725_v51 }
 0x34d   : > { %v3960_v38 = vpop.f32.mrb[84].mxu0 }
 0x34e   : > { %v2840_v3 = vadd.f32 %v3960_v38, %v5264_v34  ;;  %v2831_v48 = vpop.f32.mrb[85].mxu0 }
 0x34f   : > { %v2832_v30 = vadd.f32 %v5264_v34, %v2831_v48  ;;  %v3961_v52 = vpop.f32.mrb[86].mxu0 }
 0x350   : > { %v2912_v24 = vadd.f32 %v2896_v0, %v2840_v3  ;;  %v2843_v19 = vadd.f32 %v3961_v52, %v5264_v34  ;;  %v2834_v60 = vpop.f32.mrb[87].mxu0  ;;  %v4178_v3 = vld [vmem:[%s4450_s27 + $0x38] sm:$0xff]   ;;  %v4179_v52 = vld [vmem:[%s4450_s27 + $0x30] sm:$0xff]   ;;  %s3035_s27 = sadd.s32 %s3299_s14, %s4417_s21 }
 0x351   : > { %v2910_v31 = vadd.f32 %v2894_v5, %v2832_v30  ;;  %v2835_v16 = vadd.f32 %v5264_v34, %v2834_v60  ;;  %v2908_v48 = vunpack.c.l.bf16 %v4178_v3  ;;  %s3300_s13 = sshll.u32 %s3035_s27, 6 }
 0x352   : > { %v2913_v26 = vadd.f32 %v2897_v4, %v2843_v19  ;;  %v2928_v39 = vmax.f32 %v2912_v24, 0.0  ;;  %v2906_v24 = vunpack.c.l.bf16 %v4179_v52  ;;  %s5307_s21 = scalar_lea.hbm %s5376_s9, %s3300_s13 }
 0x353   : > { %v2911_v29 = vadd.f32 %v2895_v8, %v2835_v16  ;;  %v2926_v32 = vmax.f32 %v2910_v31, 0.0  ;;  %v2909_v16 = vunpack.c.h.bf16 %v4178_v3 }
 0x354   : > { %v2929_v23 = vmax.f32 %v2913_v26, 0.0 }
 0x355   : > { %v2927_v7 = vmax.f32 %v2911_v29, 0.0  ;;  %v3964_v46 = vpop.f32.mrb[88].mxu0 }
 0x356   : > { %v3333_v25 = vpack.c.bf16 %v2929_v23, %v2928_v39  ;;  %v2856_v57 = vadd.f32 %v3964_v46, %v5264_v34  ;;  %v2847_v11 = vpop.f32.mrb[89].mxu0  ;;  %v2907_v23 = vunpack.c.h.bf16 %v4179_v52 }
 0x357   : > { %v3328_v53 = vpack.c.bf16 %v2927_v7, %v2926_v32  ;;  %v2848_v49 = vadd.f32 %v5264_v34, %v2847_v11  ;;  %v3965_v59 = vpop.f32.mrb[90].mxu0 }
 0x358   : > { %3365 = vst [vmem:[%s5279_s26 + $0x8] sm:$0xff] %v3333_v25   ;;  %v2916_v9 = vadd.f32 %v2900_v6, %v2856_v57  ;;  %v2859_v41 = vadd.f32 %v3965_v59, %v5264_v34  ;;  %v2850_v14 = vpop.f32.mrb[91].mxu0 }
 0x359   : > { %3329 = vst [vmem:[%s5279_s26] sm:$0xff] %v3328_v53   ;;  %v2914_v62 = vadd.f32 %v2898_v50, %v2848_v49  ;;  %v2851_v15 = vadd.f32 %v5264_v34, %v2850_v14 }
 0x35a   : > { %v2917_v43 = vadd.f32 %v2901_v35, %v2859_v41  ;;  %v2932_v13 = vmax.f32 %v2916_v9, 0.0 }
 0x35b   : > { %v2915_v17 = vadd.f32 %v2899_v58, %v2851_v15  ;;  %v2930_v27 = vmax.f32 %v2914_v62, 0.0 }
 0x35c   : > { %v2933_v20 = vmax.f32 %v2917_v43, 0.0 }
 0x35d   : > { %v2931_v28 = vmax.f32 %v2915_v17, 0.0  ;;  %v3968_v2 = vpop.f32.mrb[84].mxu1 }
 0x35e   : > { %v3343_v12 = vpack.c.bf16 %v2933_v20, %v2932_v13  ;;  %v2872_v40 = vadd.f32 %v3968_v2, %v5264_v34  ;;  %v2863_v22 = vpop.f32.mrb[85].mxu1 }
 0x35f   : > { %v3338_v61 = vpack.c.bf16 %v2931_v28, %v2930_v27  ;;  %v2864_v33 = vadd.f32 %v5264_v34, %v2863_v22  ;;  %v3969_v42 = vpop.f32.mrb[86].mxu1 }
 0x360   : > { %3367 = vst [vmem:[%s5279_s26 + $0x18] sm:$0xff] %v3343_v12   ;;  %v2920_v45 = vadd.f32 %v2904_v21, %v2872_v40  ;;  %v2875_v47 = vadd.f32 %v3969_v42, %v5264_v34  ;;  %v2866_v51 = vpop.f32.mrb[87].mxu1 }
 0x361   : > { %3366 = vst [vmem:[%s5279_s26 + $0x10] sm:$0xff] %v3338_v61   ;;  %v2918_v36 = vadd.f32 %v2902_v54, %v2864_v33  ;;  %v2867_v63 = vadd.f32 %v5264_v34, %v2866_v51 }
 0x362   : > { %v2921_v0 = vadd.f32 %v2905_v37, %v2875_v47  ;;  %v2936_v5 = vmax.f32 %v2920_v45, 0.0 }
 0x363   : > { %v2919_v55 = vadd.f32 %v2903_v44, %v2867_v63  ;;  %v2934_v4 = vmax.f32 %v2918_v36, 0.0 }
 0x364   : > { %v2937_v38 = vmax.f32 %v2921_v0, 0.0 }
 0x365   : > { %v2935_v8 = vmax.f32 %v2919_v55, 0.0  ;;  %v3972_v30 = vpop.f32.mrb[88].mxu1 }
 0x366   : > { %v3353_v19 = vpack.c.bf16 %v2937_v38, %v2936_v5  ;;  %v2888_v60 = vadd.f32 %v3972_v30, %v5264_v34  ;;  %v2879_v31 = vpop.f32.mrb[89].mxu1 }
 0x367   : > { %v3348_v26 = vpack.c.bf16 %v2935_v8, %v2934_v4  ;;  %v2880_v29 = vadd.f32 %v5264_v34, %v2879_v31  ;;  %v3973_v39 = vpop.f32.mrb[90].mxu1 }
 0x368   : > { %3369 = vst [vmem:[%s5279_s26 + $0x28] sm:$0xff] %v3353_v19   ;;  %v2924_v18 = vadd.f32 %v2908_v48, %v2888_v60  ;;  %v2891_v6 = vadd.f32 %v3973_v39, %v5264_v34  ;;  %v2882_v32 = vpop.f32.mrb[91].mxu1 }
 0x369   : > { %3368 = vst [vmem:[%s5279_s26 + $0x20] sm:$0xff] %v3348_v26   ;;  %v2922_v7 = vadd.f32 %v2906_v24, %v2880_v29  ;;  %v2883_v46 = vadd.f32 %v5264_v34, %v2882_v32 }
 0x36a   : > { %v2925_v10 = vadd.f32 %v2909_v16, %v2891_v6  ;;  %v2940_v25 = vmax.f32 %v2924_v18, 0.0 }
 0x36b   : > { %v2923_v50 = vadd.f32 %v2907_v23, %v2883_v46  ;;  %v2938_v11 = vmax.f32 %v2922_v7, 0.0 }
 0x36c   : > { %v2941_v57 = vmax.f32 %v2925_v10, 0.0 }
 0x36d   : > { %v2939_v35 = vmax.f32 %v2923_v50, 0.0 }
 0x36e   : > { %v3363_v53 = vpack.c.bf16 %v2941_v57, %v2940_v25 }
 0x36f   : > { %v3358_v34 = vpack.c.bf16 %v2939_v35, %v2938_v11 }
 0x370   : > { %3371 = vst [vmem:[%s5279_s26 + $0x38] sm:$0xff] %v3363_v53  }
 0x371   : > { %3370 = vst [vmem:[%s5279_s26 + $0x30] sm:$0xff] %v3358_v34  }
 0x372   : > { %4193 = shalt.err (!%p4190_p0)
}
 0x373   : > { %s4194_s15 = scalar_lea.hbm %s5307_s21, 1024  ;;  %s4198_s26 = scalar_lea.hbm %s5376_s9, 4096 }
 0x374   : > { %p4195_p1 = scmp.ne.s32.totalorder %s5307_s21, %s4194_s15  ;;  %p4199_p5 = scmp.lt.u32.totalorder %s5307_s21, %s5376_s9 }
 0x375   : > { %p4200_p6 = scmp.lt.u32.totalorder %s4198_s26, %s4194_s15  ;;  %p4202_p9 = scmp.lt.u32.totalorder %s4194_s15, %s5307_s21 }
 0x376   : > { %p4196_p2 = pnand %p4195_p1, %p4383_p3 }
 0x377   : > { %p4201_p7 = por %p4200_p6, %p4199_p5 }
 0x378   : > { %p4197_p4 = pneg %p4196_p2 }
 0x379   : > { %p4203_p10 = por %p4202_p9, %p4201_p7 }
 0x37b   : > { %p4204_p11 = pnand %p4203_p10, %p4197_p4 }
 0x37d   : > { %4207 = shalt.err (!%p4204_p11)
}
 0x37e   : > { %s4280_s13 = smov 64   ;;  %s4281_s12 = smov 4  }
 0x37f   : > { %3990 = dma.vmem_to_hbm [thread:$0]  (%p4383_p3), %s5309_s0, 1024, %s5307_s21, %s5315_s24, %s4280_s13, %s4280_s13, %s4281_s12  }
 0x380 PF: > { %p3996_p12 = scmp.ge.s32.totalorder %s4274_s16, 2  ;;  %s3053_s19 = sand.u32 1, %s4246_s30  }
 0x381   : > { %s3054_s25 = scalar_lea.sflag [#allocation5], %s3053_s19 }
 0x382   : > { %p3993_p13 = pnand %p3996_p12, %p4392_p8 }
 0x384   : > { %4241 = dma.done.wait (!%p3993_p13), %s3054_s25, 1024  }
 0x385   : > { %4243 = vsyncadd (!%p3993_p13), %s3054_s25, 4294966272  ;;  %s22_s16 = sadd.s32 1, %s4274_s16   ;;  %s5439_s20 = sld [smem:[#allocation11_spill]] }
 0x386   : > { %p19_p0 = scmp.ge.s32.totalorder %s22_s16, 6   ;;  %s5440_s12 = sld [smem:[#allocation7_spill]] }
 0x387   : > { %s5441_s13 = sld [smem:[#allocation8_spill]]  ;;  %s5442_s14 = sld [smem:[#allocation9_spill]] }
 0x388   : > { %s5443_s15 = sld [smem:[#allocation10_spill]]  ;;  %s5444_s30 = smov %s4250_s10 }
 0x389   : > { %s5445_s10 = smov %s4254_s11  ;;  %21 = sbr.rel (!%p19_p0) target bundleno = 7 (0x7), region = 97 }
 0x38b   : > { %s5446_s11 = smov %s5439_s20 }
 0x390   :  { %3059 = vsyncpa [#allocation5], 1 }
 0x391   :  { %3061 = vsyncpa [#allocation5 + $0x1], 1 }

</bundles_post_ra>
